<compile_context>
chip_gen: v7x
topology: tpu7x:2x2x1
jax: 0.10.0
libtpu: 0.0.40
codegen_flags: <defaults>
</compile_context>

<pallas_src>
import jax
import jax.numpy as jnp
from jax import lax
from jax.experimental import pallas as pl
from jax.experimental.pallas import tpu as pltpu


_VMEM_LIMIT = 48 * 1024 * 1024  # fits v7x (64 MiB phys) with headroom


def _round_up(n, m):
    return ((n + m - 1) // m) * m


def _pick_t_chunk(T, b_pad, gate_width, hidden,
                  budget_bytes=8 * 1024 * 1024, max_unroll=16):
    """Largest divisor of T that keeps (double-buffered gx + y chunk) small
    and the in-kernel unroll bounded."""
    per_step = b_pad * (gate_width + hidden) * 4 * 2  # f32, 2x for dbl-buffer
    cap = max(1, min(T, max_unroll, budget_bytes // max(per_step, 1)))
    for tc in range(cap, 0, -1):
        if T % tc == 0:
            return tc
    return 1


# ---------------------------------------------------------------------------
# Kernel 1: whole-sequence input projection  gx = x @ W_ih^T + (b_ih + b_hh)
# Row-tiled grid ("parallel") -> pipelined DMA, bounded VMEM.
# ---------------------------------------------------------------------------
def _input_proj_kernel(x_ref, w_ref, b_ref, o_ref):
    o_ref[...] = (
        jnp.dot(x_ref[...], w_ref[...], preferred_element_type=jnp.float32)
        + b_ref[...]
    ).astype(o_ref.dtype)


def input_projection(x_flat, w_ih_t, bias, row_tile=256):
    """x_flat: (T*B, Cin), w_ih_t: (Cin, 4H), bias: (1, 4H) -> (T*B, 4H)."""
    TB, Cin = x_flat.shape
    G = w_ih_t.shape[1]
    tm = min(row_tile, TB)          # TB is a multiple of 8 (batch padded)
    grid = (pl.cdiv(TB, tm),)
    return pl.pallas_call(
        _input_proj_kernel,
        out_shape=jax.ShapeDtypeStruct((TB, G), jnp.float32),
        grid=grid,
        in_specs=[
            pl.BlockSpec((tm, Cin), lambda i: (i, 0)),
            pl.BlockSpec((Cin, G), lambda i: (0, 0)),
            pl.BlockSpec((1, G), lambda i: (0, 0)),
        ],
        out_specs=pl.BlockSpec((tm, G), lambda i: (i, 0)),
        compiler_params=pltpu.CompilerParams(
            dimension_semantics=("parallel",),
            vmem_limit_bytes=_VMEM_LIMIT),
    )(x_flat, w_ih_t, bias)


# ---------------------------------------------------------------------------
# Kernel 2: LSTM time recurrence, T-chunked grid, fused (H, 4H) recurrent dot.
# h/c state lives in VMEM scratch across grid steps (grid is a sequential loop
# on TPU); gx chunks stream in, y chunks stream out.
# ---------------------------------------------------------------------------
def _recurrence_steps(gx_ref, whh_ref, h, c, hidden, y_ref=None):
    """Run the chunk's time steps; returns (h, c) after the chunk."""
    t_chunk = gx_ref.shape[0]
    w = whh_ref[...]                     # (H, 4H), stays VMEM/vreg resident

    def step(t, carry):
        h, c = carry
        # ONE fused recurrent matmul per step (lane-dense 4H-wide RHS).
        gates = gx_ref[t] + jnp.dot(h, w, preferred_element_type=jnp.float32)
        i_g = jax.nn.sigmoid(gates[:, 0 * hidden:1 * hidden])
        f_g = jax.nn.sigmoid(gates[:, 1 * hidden:2 * hidden])
        g_g = jnp.tanh(gates[:, 2 * hidden:3 * hidden])
        o_g = jax.nn.sigmoid(gates[:, 3 * hidden:4 * hidden])
        c_new = f_g * c + i_g * g_g
        h_new = o_g * jnp.tanh(c_new)
        if y_ref is not None:
            y_ref[t] = h_new.astype(y_ref.dtype)
        return h_new, c_new

    # Bounded trip count (T_chunk <= 16) -> full unroll for LLO visibility.
    return lax.fori_loop(0, t_chunk, step, (h, c), unroll=True)


def _lstm_seq_kernel(gx_ref, h0_ref, c0_ref, whh_ref,
                     y_ref, hn_ref, cn_ref, h_sc, c_sc):
    @pl.when(pl.program_id(0) == 0)
    def _():
        h_sc[...] = h0_ref[...]
        c_sc[...] = c0_ref[...]

    hidden = h0_ref.shape[-1]
    h, c = _recurrence_steps(gx_ref, whh_ref, h_sc[...], c_sc[...],
                             hidden, y_ref)
    h_sc[...] = h
    c_sc[...] = c
    hn_ref[...] = h.astype(hn_ref.dtype)
    cn_ref[...] = c.astype(cn_ref.dtype)


def _lstm_last_fc_kernel(gx_ref, h0_ref, c0_ref, whh_ref, fcw_ref, fcb_ref,
                         out_ref, hn_ref, cn_ref, h_sc, c_sc):
    @pl.when(pl.program_id(0) == 0)
    def _():
        h_sc[...] = h0_ref[...]
        c_sc[...] = c0_ref[...]

    hidden = h0_ref.shape[-1]
    h, c = _recurrence_steps(gx_ref, whh_ref, h_sc[...], c_sc[...],
                             hidden, None)
    h_sc[...] = h
    c_sc[...] = c
    hn_ref[...] = h.astype(hn_ref.dtype)
    cn_ref[...] = c.astype(cn_ref.dtype)

    @pl.when(pl.program_id(0) == pl.num_programs(0) - 1)
    def _():
        out_ref[...] = (
            jnp.dot(jnp.maximum(h, 0.0), fcw_ref[...],
                    preferred_element_type=jnp.float32)
            + fcb_ref[...]
        ).astype(out_ref.dtype)


def lstm_layer_seq(gx, h0, c0, w_hh_t, t_chunk):
    """Non-last layer: gx (T,B,4H) -> y (T,B,H), h_n (B,H), c_n (B,H)."""
    T, B, G = gx.shape
    H = w_hh_t.shape[0]
    grid = (T // t_chunk,)
    return pl.pallas_call(
        _lstm_seq_kernel,
        out_shape=(
            jax.ShapeDtypeStruct((T, B, H), jnp.float32),
            jax.ShapeDtypeStruct((B, H), jnp.float32),
            jax.ShapeDtypeStruct((B, H), jnp.float32),
        ),
        grid=grid,
        in_specs=[
            pl.BlockSpec((t_chunk, B, G), lambda t: (t, 0, 0)),
            pl.BlockSpec((B, H), lambda t: (0, 0)),
            pl.BlockSpec((B, H), lambda t: (0, 0)),
            pl.BlockSpec((H, G), lambda t: (0, 0)),
        ],
        out_specs=(
            pl.BlockSpec((t_chunk, B, H), lambda t: (t, 0, 0)),
            pl.BlockSpec((B, H), lambda t: (0, 0)),
            pl.BlockSpec((B, H), lambda t: (0, 0)),
        ),
        scratch_shapes=[pltpu.VMEM((B, H), jnp.float32),
                        pltpu.VMEM((B, H), jnp.float32)],
        compiler_params=pltpu.CompilerParams(
            dimension_semantics=("arbitrary",),
            vmem_limit_bytes=_VMEM_LIMIT),
    )(gx, h0, c0, w_hh_t)


def lstm_last_layer_fc(gx, h0, c0, w_hh_t, fc_w_t, fc_b, t_chunk):
    """Last layer fused with fc(relu(h_T)): gx (T,B,4H) -> out (B,O), h_n, c_n."""
    T, B, G = gx.shape
    H = w_hh_t.shape[0]
    O = fc_w_t.shape[1]
    grid = (T // t_chunk,)
    return pl.pallas_call(
        _lstm_last_fc_kernel,
        out_shape=(
            jax.ShapeDtypeStruct((B, O), jnp.float32),
            jax.ShapeDtypeStruct((B, H), jnp.float32),
            jax.ShapeDtypeStruct((B, H), jnp.float32),
        ),
        grid=grid,
        in_specs=[
            pl.BlockSpec((t_chunk, B, G), lambda t: (t, 0, 0)),
            pl.BlockSpec((B, H), lambda t: (0, 0)),
            pl.BlockSpec((B, H), lambda t: (0, 0)),
            pl.BlockSpec((H, G), lambda t: (0, 0)),
            pl.BlockSpec((H, O), lambda t: (0, 0)),
            pl.BlockSpec((1, O), lambda t: (0, 0)),
        ],
        out_specs=(
            pl.BlockSpec((B, O), lambda t: (0, 0)),
            pl.BlockSpec((B, H), lambda t: (0, 0)),
            pl.BlockSpec((B, H), lambda t: (0, 0)),
        ),
        scratch_shapes=[pltpu.VMEM((B, H), jnp.float32),
                        pltpu.VMEM((B, H), jnp.float32)],
        compiler_params=pltpu.CompilerParams(
            dimension_semantics=("arbitrary",),
            vmem_limit_bytes=_VMEM_LIMIT),
    )(gx, h0, c0, w_hh_t, fc_w_t, fc_b)


# ---------------------------------------------------------------------------
# Full LSTMNet forward
# ---------------------------------------------------------------------------
def lstm_net_forward(packed, x_btf, h):
    """x_btf: (B, T, input_dim) batch-first; h = (h0, c0) each (L, B, H).

    Returns (out[B, output_dim], (h_n[L,B,H], c_n[L,B,H])).
    """
    h0_all, c0_all = h
    B, T, _ = x_btf.shape
    n_layers = len(packed["lstm"])

    # Batch padded to a multiple of 8 so the per-step matmul LHS fills
    # sublanes; padded rows are independent and sliced off at the end.
    B_pad = max(8, _round_up(B, 8))
    seq = jnp.transpose(x_btf, (1, 0, 2))                 # (T, B, I) time-major
    if B_pad != B:
        seq = jnp.pad(seq, ((0, 0), (0, B_pad - B), (0, 0)))
        h0_all = jnp.pad(h0_all, ((0, 0), (0, B_pad - B), (0, 0)))
        c0_all = jnp.pad(c0_all, ((0, 0), (0, B_pad - B), (0, 0)))

    out = None
    h_ns, c_ns = [], []
    for l, layer in enumerate(packed["lstm"]):
        H = layer["w_hh_t"].shape[0]
        G = 4 * H
        Cin = seq.shape[-1]
        # Whole-sequence input projection (one big tiled matmul, incl. bias).
        gx2d = input_projection(seq.reshape(T * B_pad, Cin),
                                layer["w_ih_t"], layer["bias"])   # (T*B, 4H)
        gx = gx2d.reshape(T, B_pad, G)        # contiguous regroup (no copy)
        t_chunk = _pick_t_chunk(T, B_pad, G, H)
        if l < n_layers - 1:
            y, h_n, c_n = lstm_layer_seq(gx, h0_all[l], c0_all[l],
                                         layer["w_hh_t"], t_chunk)
            seq = y
        else:
            out, h_n, c_n = lstm_last_layer_fc(
                gx, h0_all[l], c0_all[l], layer["w_hh_t"],
                packed["fc_w_t"], packed["fc_b"], t_chunk)
        h_ns.append(h_n)
        c_ns.append(c_n)

    h_n_all = jnp.stack(h_ns, 0)[:, :B]
    c_n_all = jnp.stack(c_ns, 0)[:, :B]
    return out[:B], (h_n_all, c_n_all)


# ---------------------------------------------------------------------------
# Parameters (PyTorch-style uniform init) and kernel-layout packing
# ---------------------------------------------------------------------------
def make_params(key, input_dim, hidden_dim, output_dim, n_layers):
    bound = 1.0 / jnp.sqrt(hidden_dim)
    layers = []
    for l in range(n_layers):
        in_dim = input_dim if l == 0 else hidden_dim
        key, k1, k2, k3, k4 = jax.random.split(key, 5)
        w_ih = jax.random.uniform(k1, (4 * hidden_dim, in_dim),
                                  jnp.float32, -bound, bound)
        w_hh = jax.random.uniform(k2, (4 * hidden_dim, hidden_dim),
                                  jnp.float32, -bound, bound)
        b_ih = jax.random.uniform(k3, (4 * hidden_dim,),
                                  jnp.float32, -bound, bound)
        b_hh = jax.random.uniform(k4, (4 * hidden_dim,),
                                  jnp.float32, -bound, bound)
        layers.append({"w_ih": w_ih, "w_hh": w_hh,
                       "bias": (b_ih + b_hh)[None, :]})
    key, k5, k6 = jax.random.split(key, 3)
    fb = 1.0 / jnp.sqrt(hidden_dim)
    fc_w = jax.random.uniform(k5, (output_dim, hidden_dim),
                              jnp.float32, -fb, fb)
    fc_b = jax.random.uniform(k6, (1, output_dim), jnp.float32, -fb, fb)
    return {"lstm": layers, "fc_w": fc_w, "fc_b": fc_b}


def pack_params(params):
    """One-time weight re-layout so no transposes happen inside kernels."""
    packed_layers = []
    for layer in params["lstm"]:
        packed_layers.append({
            "w_ih_t": jnp.transpose(layer["w_ih"]),     # (Cin, 4H)
            "w_hh_t": jnp.transpose(layer["w_hh"]),     # (H, 4H) fused gates
            "bias": layer["bias"],                      # (1, 4H) = b_ih + b_hh
        })
    return {"lstm": packed_layers,
            "fc_w_t": jnp.transpose(params["fc_w"]),    # (H, O)
            "fc_b": params["fc_b"]}                     # (1, O)


# ---------------------------------------------------------------------------
# Pure-JAX reference (for correctness check), uses the raw PyTorch layout
# ---------------------------------------------------------------------------
def reference_forward(params, x_btf, h):
    h0_all, c0_all = h
    H = h0_all.shape[-1]
    x = jnp.transpose(x_btf, (1, 0, 2))
    h_ns, c_ns = [], []
    for l, layer in enumerate(params["lstm"]):
        h_t, c_t = h0_all[l], c0_all[l]
        ys = []
        for t in range(x.shape[0]):
            g = x[t] @ layer["w_ih"].T + h_t @ layer["w_hh"].T + layer["bias"]
            i = jax.nn.sigmoid(g[:, 0:H])
            f = jax.nn.sigmoid(g[:, H:2 * H])
            gg = jnp.tanh(g[:, 2 * H:3 * H])
            o = jax.nn.sigmoid(g[:, 3 * H:4 * H])
            c_t = f * c_t + i * gg
            h_t = o * jnp.tanh(c_t)
            ys.append(h_t)
        x = jnp.stack(ys, 0)
        h_ns.append(h_t)
        c_ns.append(c_t)
    out = jnp.maximum(x[-1], 0.0) @ params["fc_w"].T + params["fc_b"]
    return out, (jnp.stack(h_ns, 0), jnp.stack(c_ns, 0))


if __name__ == "__main__":
    input_dim, hidden_dim, output_dim, n_layers = 8, 32, 4, 2
    batch, seq_len = 2, 8

    key = jax.random.PRNGKey(0)
    pkey, xkey = jax.random.split(key)
    params = make_params(pkey, input_dim, hidden_dim, output_dim, n_layers)
    packed = pack_params(params)

    x = jax.random.normal(xkey, (batch, seq_len, input_dim), jnp.float32)
    h0 = jnp.zeros((n_layers, batch, hidden_dim), jnp.float32)  # init_hidden
    c0 = jnp.zeros((n_layers, batch, hidden_dim), jnp.float32)

    fwd = jax.jit(lstm_net_forward)
    out, (h_n, c_n) = fwd(packed, x, (h0, c0))
    jax.block_until_ready((out, h_n, c_n))

    ref_out, (ref_h, ref_c) = reference_forward(params, x, (h0, c0))
    assert out.shape == (batch, output_dim)
    assert h_n.shape == (n_layers, batch, hidden_dim)
    assert c_n.shape == (n_layers, batch, hidden_dim)
    assert jnp.allclose(out, ref_out, atol=1e-4), "fc output mismatch"
    assert jnp.allclose(h_n, ref_h, atol=1e-4), "h_n mismatch"
    assert jnp.allclose(c_n, ref_c, atol=1e-4), "c_n mismatch"

    print("KERNEL_OK")
</pallas_src>

<mosaic_0001>
module attributes {stable_mosaic.version = 11 : i64} {
  func.func @_input_proj_kernel(%arg0: i32, %arg1: memref<64x8xf32, #tpu.memory_space<vmem>>, %arg2: memref<8x128xf32, #tpu.memory_space<vmem>>, %arg3: memref<1x128xf32, #tpu.memory_space<vmem>>, %arg4: memref<64x128xf32, #tpu.memory_space<vmem>>) attributes {dimension_semantics = [#tpu.dimension_semantics<parallel>], iteration_bounds = array<i64: 1>, scalar_prefetch = 0 : i64, scratch_operands = 0 : i64, tpu.core_type = #tpu.core_type<tc>, window_params = [{transform_indices = @transform_0, window_bounds = array<i64: 64, 8>}, {pipeline_mode = #tpu.pipeline_mode<synchronous>, transform_indices = @transform_1, window_bounds = array<i64: 8, 128>}, {pipeline_mode = #tpu.pipeline_mode<synchronous>, transform_indices = @transform_2, window_bounds = array<i64: 1, 128>}, {transform_indices = @transform_3, window_bounds = array<i64: 64, 128>}]} {
    %c0 = arith.constant 0 : index
    %c0_0 = arith.constant 0 : index
    %0 = vector.load %arg1[%c0, %c0_0] : memref<64x8xf32, #tpu.memory_space<vmem>>, vector<64x8xf32>
    %c0_1 = arith.constant 0 : index
    %c0_2 = arith.constant 0 : index
    %1 = vector.load %arg2[%c0_1, %c0_2] : memref<8x128xf32, #tpu.memory_space<vmem>>, vector<8x128xf32>
    %cst = arith.constant dense<0.000000e+00> : vector<64x128xf32>
    %2 = tpu.matmul %0, %1, %cst {dimension_numbers = #tpu.dot_dimension_numbers<[1], [0], [0], [1], [0, 0, 1, 1], [], []>} : vector<64x8xf32>, vector<8x128xf32>, vector<64x128xf32> -> vector<64x128xf32>
    %c0_3 = arith.constant 0 : index
    %c0_4 = arith.constant 0 : index
    %3 = vector.load %arg3[%c0_3, %c0_4] : memref<1x128xf32, #tpu.memory_space<vmem>>, vector<1x128xf32>
    %4 = vector.broadcast %3 : vector<1x128xf32> to vector<64x128xf32>
    %5 = arith.addf %2, %4 : vector<64x128xf32>
    %c0_5 = arith.constant 0 : index
    %c0_6 = arith.constant 0 : index
    %6 = vector.load %arg4[%c0_5, %c0_6] : memref<64x128xf32, #tpu.memory_space<vmem>>, vector<64x128xf32>
    tpu.vector_store %arg4[%c0_5, %c0_6], %5 {strides = array<i32>} : memref<64x128xf32, #tpu.memory_space<vmem>>, vector<64x128xf32>,
    return
  }
  func.func @transform_0(%arg0: i32) -> (i32, i32) {
    %c0_i32 = arith.constant 0 : i32
    %c0_i32_0 = arith.constant 0 : i32
    return %arg0, %c0_i32 : i32, i32
  }
  func.func @transform_1(%arg0: i32) -> (i32, i32) {
    %c0_i32 = arith.constant 0 : i32
    %c0_i32_0 = arith.constant 0 : i32
    %c0_i32_1 = arith.constant 0 : i32
    return %c0_i32, %c0_i32_0 : i32, i32
  }
  func.func @transform_2(%arg0: i32) -> (i32, i32) {
    %c0_i32 = arith.constant 0 : i32
    %c0_i32_0 = arith.constant 0 : i32
    %c0_i32_1 = arith.constant 0 : i32
    return %c0_i32, %c0_i32_0 : i32, i32
  }
  func.func @transform_3(%arg0: i32) -> (i32, i32) {
    %c0_i32 = arith.constant 0 : i32
    %c0_i32_0 = arith.constant 0 : i32
    return %arg0, %c0_i32 : i32, i32
  }
}

module attributes {stable_mosaic.version = 11 : i64} {
  func.func @_input_proj_kernel(%arg0: i32, %arg1: memref<64x32xf32, #tpu.memory_space<vmem>>, %arg2: memref<32x128xf32, #tpu.memory_space<vmem>>, %arg3: memref<1x128xf32, #tpu.memory_space<vmem>>, %arg4: memref<64x128xf32, #tpu.memory_space<vmem>>) attributes {dimension_semantics = [#tpu.dimension_semantics<parallel>], iteration_bounds = array<i64: 1>, scalar_prefetch = 0 : i64, scratch_operands = 0 : i64, tpu.core_type = #tpu.core_type<tc>, window_params = [{transform_indices = @transform_0, window_bounds = array<i64: 64, 32>}, {pipeline_mode = #tpu.pipeline_mode<synchronous>, transform_indices = @transform_1, window_bounds = array<i64: 32, 128>}, {pipeline_mode = #tpu.pipeline_mode<synchronous>, transform_indices = @transform_2, window_bounds = array<i64: 1, 128>}, {transform_indices = @transform_3, window_bounds = array<i64: 64, 128>}]} {
    %c0 = arith.constant 0 : index
    %c0_0 = arith.constant 0 : index
    %0 = vector.load %arg1[%c0, %c0_0] : memref<64x32xf32, #tpu.memory_space<vmem>>, vector<64x32xf32>
    %c0_1 = arith.constant 0 : index
    %c0_2 = arith.constant 0 : index
    %1 = vector.load %arg2[%c0_1, %c0_2] : memref<32x128xf32, #tpu.memory_space<vmem>>, vector<32x128xf32>
    %cst = arith.constant dense<0.000000e+00> : vector<64x128xf32>
    %2 = tpu.matmul %0, %1, %cst {dimension_numbers = #tpu.dot_dimension_numbers<[1], [0], [0], [1], [0, 0, 1, 1], [], []>} : vector<64x32xf32>, vector<32x128xf32>, vector<64x128xf32> -> vector<64x128xf32>
    %c0_3 = arith.constant 0 : index
    %c0_4 = arith.constant 0 : index
    %3 = vector.load %arg3[%c0_3, %c0_4] : memref<1x128xf32, #tpu.memory_space<vmem>>, vector<1x128xf32>
    %4 = vector.broadcast %3 : vector<1x128xf32> to vector<64x128xf32>
    %5 = arith.addf %2, %4 : vector<64x128xf32>
    %c0_5 = arith.constant 0 : index
    %c0_6 = arith.constant 0 : index
    %6 = vector.load %arg4[%c0_5, %c0_6] : memref<64x128xf32, #tpu.memory_space<vmem>>, vector<64x128xf32>
    tpu.vector_store %arg4[%c0_5, %c0_6], %5 {strides = array<i32>} : memref<64x128xf32, #tpu.memory_space<vmem>>, vector<64x128xf32>,
    return
  }
  func.func @transform_0(%arg0: i32) -> (i32, i32) {
    %c0_i32 = arith.constant 0 : i32
    %c0_i32_0 = arith.constant 0 : i32
    return %arg0, %c0_i32 : i32, i32
  }
  func.func @transform_1(%arg0: i32) -> (i32, i32) {
    %c0_i32 = arith.constant 0 : i32
    %c0_i32_0 = arith.constant 0 : i32
    %c0_i32_1 = arith.constant 0 : i32
    return %c0_i32, %c0_i32_0 : i32, i32
  }
  func.func @transform_2(%arg0: i32) -> (i32, i32) {
    %c0_i32 = arith.constant 0 : i32
    %c0_i32_0 = arith.constant 0 : i32
    %c0_i32_1 = arith.constant 0 : i32
    return %c0_i32, %c0_i32_0 : i32, i32
  }
  func.func @transform_3(%arg0: i32) -> (i32, i32) {
    %c0_i32 = arith.constant 0 : i32
    %c0_i32_0 = arith.constant 0 : i32
    return %arg0, %c0_i32 : i32, i32
  }
}

module attributes {stable_mosaic.version = 11 : i64} {
  func.func @_lstm_seq_kernel(%arg0: i32, %arg1: memref<8x8x128xf32, #tpu.memory_space<vmem>>, %arg2: memref<8x32xf32, #tpu.memory_space<vmem>>, %arg3: memref<8x32xf32, #tpu.memory_space<vmem>>, %arg4: memref<32x128xf32, #tpu.memory_space<vmem>>, %arg5: memref<8x8x32xf32, #tpu.memory_space<vmem>>, %arg6: memref<8x32xf32, #tpu.memory_space<vmem>>, %arg7: memref<8x32xf32, #tpu.memory_space<vmem>>, %arg8: memref<8x32xf32, #tpu.memory_space<vmem>>, %arg9: memref<8x32xf32, #tpu.memory_space<vmem>>) attributes {dimension_semantics = [#tpu.dimension_semantics<arbitrary>], iteration_bounds = array<i64: 1>, scalar_prefetch = 0 : i64, scratch_operands = 2 : i64, tpu.core_type = #tpu.core_type<tc>, window_params = [{transform_indices = @transform_0, window_bounds = array<i64: 8, 8, 128>}, {pipeline_mode = #tpu.pipeline_mode<synchronous>, transform_indices = @transform_1, window_bounds = array<i64: 8, 32>}, {pipeline_mode = #tpu.pipeline_mode<synchronous>, transform_indices = @transform_2, window_bounds = array<i64: 8, 32>}, {pipeline_mode = #tpu.pipeline_mode<synchronous>, transform_indices = @transform_3, window_bounds = array<i64: 32, 128>}, {transform_indices = @transform_4, window_bounds = array<i64: 8, 8, 32>}, {pipeline_mode = #tpu.pipeline_mode<synchronous>, transform_indices = @transform_5, window_bounds = array<i64: 8, 32>}, {pipeline_mode = #tpu.pipeline_mode<synchronous>, transform_indices = @transform_6, window_bounds = array<i64: 8, 32>}]} {
    %c0_i32 = arith.constant 0 : i32
    %0 = arith.cmpi eq, %arg0, %c0_i32 : i32
    %1 = arith.extui %0 : i1 to i32
    %c0_i32_0 = arith.constant 0 : i32
    %2 = arith.cmpi ne, %1, %c0_i32_0 : i32
    scf.if %2 {
      %c0_78 = arith.constant 0 : index
      %c0_79 = arith.constant 0 : index
      %282 = vector.load %arg2[%c0_78, %c0_79] : memref<8x32xf32, #tpu.memory_space<vmem>>, vector<8x32xf32>
      %c0_80 = arith.constant 0 : index
      %c0_81 = arith.constant 0 : index
      %283 = vector.load %arg8[%c0_80, %c0_81] : memref<8x32xf32, #tpu.memory_space<vmem>>, vector<8x32xf32>
      tpu.vector_store %arg8[%c0_80, %c0_81], %282 {strides = array<i32>} : memref<8x32xf32, #tpu.memory_space<vmem>>, vector<8x32xf32>,
      %c0_82 = arith.constant 0 : index
      %c0_83 = arith.constant 0 : index
      %284 = vector.load %arg3[%c0_82, %c0_83] : memref<8x32xf32, #tpu.memory_space<vmem>>, vector<8x32xf32>
      %c0_84 = arith.constant 0 : index
      %c0_85 = arith.constant 0 : index
      %285 = vector.load %arg9[%c0_84, %c0_85] : memref<8x32xf32, #tpu.memory_space<vmem>>, vector<8x32xf32>
      tpu.vector_store %arg9[%c0_84, %c0_85], %284 {strides = array<i32>} : memref<8x32xf32, #tpu.memory_space<vmem>>, vector<8x32xf32>,
    } else {
    }
    %c0 = arith.constant 0 : index
    %c0_1 = arith.constant 0 : index
    %3 = vector.load %arg8[%c0, %c0_1] : memref<8x32xf32, #tpu.memory_space<vmem>>, vector<8x32xf32>
    %c0_2 = arith.constant 0 : index
    %c0_3 = arith.constant 0 : index
    %4 = vector.load %arg9[%c0_2, %c0_3] : memref<8x32xf32, #tpu.memory_space<vmem>>, vector<8x32xf32>
    %c0_4 = arith.constant 0 : index
    %c0_5 = arith.constant 0 : index
    %5 = vector.load %arg4[%c0_4, %c0_5] : memref<32x128xf32, #tpu.memory_space<vmem>>, vector<32x128xf32>
    %c0_i32_6 = arith.constant 0 : i32
    %6 = arith.index_cast %c0_i32_6 : i32 to index
    %c0_7 = arith.constant 0 : index
    %c0_8 = arith.constant 0 : index
    %7 = vector.load %arg1[%6, %c0_7, %c0_8] : memref<8x8x128xf32, #tpu.memory_space<vmem>>, vector<1x8x128xf32>
    %8 = vector.shape_cast %7 : vector<1x8x128xf32> to vector<8x128xf32>
    %cst = arith.constant dense<0.000000e+00> : vector<8x128xf32>
    %9 = tpu.matmul %3, %5, %cst {dimension_numbers = #tpu.dot_dimension_numbers<[1], [0], [0], [1], [0, 0, 1, 1], [], []>} : vector<8x32xf32>, vector<32x128xf32>, vector<8x128xf32> -> vector<8x128xf32>
    %10 = arith.addf %8, %9 : vector<8x128xf32>
    %11 = vector.extract_strided_slice %10 {offsets = [0, 0], sizes = [8, 32], strides = [1, 1]} : vector<8x128xf32> to vector<8x32xf32>
    %12 = arith.negf %11 : vector<8x32xf32>
    %13 = math.exp %12 : vector<8x32xf32>
    %cst_9 = arith.constant 1.000000e+00 : f32
    %14 = vector.broadcast %cst_9 : f32 to vector<8x32xf32>
    %15 = arith.addf %14, %13 : vector<8x32xf32>
    %16 = arith.divf %14, %15 : vector<8x32xf32>
    %17 = vector.extract_strided_slice %10 {offsets = [0, 32], sizes = [8, 32], strides = [1, 1]} : vector<8x128xf32> to vector<8x32xf32>
    %18 = arith.negf %17 : vector<8x32xf32>
    %19 = math.exp %18 : vector<8x32xf32>
    %cst_10 = arith.constant 1.000000e+00 : f32
    %20 = vector.broadcast %cst_10 : f32 to vector<8x32xf32>
    %21 = arith.addf %20, %19 : vector<8x32xf32>
    %22 = arith.divf %20, %21 : vector<8x32xf32>
    %23 = vector.extract_strided_slice %10 {offsets = [0, 64], sizes = [8, 32], strides = [1, 1]} : vector<8x128xf32> to vector<8x32xf32>
    %24 = math.tanh %23 : vector<8x32xf32>
    %25 = vector.extract_strided_slice %10 {offsets = [0, 96], sizes = [8, 32], strides = [1, 1]} : vector<8x128xf32> to vector<8x32xf32>
    %26 = arith.negf %25 : vector<8x32xf32>
    %27 = math.exp %26 : vector<8x32xf32>
    %cst_11 = arith.constant 1.000000e+00 : f32
    %28 = vector.broadcast %cst_11 : f32 to vector<8x32xf32>
    %29 = arith.addf %28, %27 : vector<8x32xf32>
    %30 = arith.divf %28, %29 : vector<8x32xf32>
    %31 = arith.mulf %22, %4 : vector<8x32xf32>
    %32 = arith.mulf %16, %24 : vector<8x32xf32>
    %33 = arith.addf %31, %32 : vector<8x32xf32>
    %34 = math.tanh %33 : vector<8x32xf32>
    %35 = arith.mulf %30, %34 : vector<8x32xf32>
    %36 = arith.index_cast %c0_i32_6 : i32 to index
    %c0_12 = arith.constant 0 : index
    %c0_13 = arith.constant 0 : index
    %37 = vector.load %arg5[%36, %c0_12, %c0_13] : memref<8x8x32xf32, #tpu.memory_space<vmem>>, vector<1x8x32xf32>
    %38 = vector.shape_cast %37 : vector<1x8x32xf32> to vector<8x32xf32>
    %39 = vector.shape_cast %35 : vector<8x32xf32> to vector<1x8x32xf32>
    tpu.vector_store %arg5[%36, %c0_12, %c0_13], %39 {strides = array<i32>} : memref<8x8x32xf32, #tpu.memory_space<vmem>>, vector<1x8x32xf32>,
    %c1_i32 = arith.constant 1 : i32
    %40 = arith.index_cast %c1_i32 : i32 to index
    %c0_14 = arith.constant 0 : index
    %c0_15 = arith.constant 0 : index
    %41 = vector.load %arg1[%40, %c0_14, %c0_15] : memref<8x8x128xf32, #tpu.memory_space<vmem>>, vector<1x8x128xf32>
    %42 = vector.shape_cast %41 : vector<1x8x128xf32> to vector<8x128xf32>
    %cst_16 = arith.constant dense<0.000000e+00> : vector<8x128xf32>
    %43 = tpu.matmul %35, %5, %cst_16 {dimension_numbers = #tpu.dot_dimension_numbers<[1], [0], [0], [1], [0, 0, 1, 1], [], []>} : vector<8x32xf32>, vector<32x128xf32>, vector<8x128xf32> -> vector<8x128xf32>
    %44 = arith.addf %42, %43 : vector<8x128xf32>
    %45 = vector.extract_strided_slice %44 {offsets = [0, 0], sizes = [8, 32], strides = [1, 1]} : vector<8x128xf32> to vector<8x32xf32>
    %46 = arith.negf %45 : vector<8x32xf32>
    %47 = math.exp %46 : vector<8x32xf32>
    %cst_17 = arith.constant 1.000000e+00 : f32
    %48 = vector.broadcast %cst_17 : f32 to vector<8x32xf32>
    %49 = arith.addf %48, %47 : vector<8x32xf32>
    %50 = arith.divf %48, %49 : vector<8x32xf32>
    %51 = vector.extract_strided_slice %44 {offsets = [0, 32], sizes = [8, 32], strides = [1, 1]} : vector<8x128xf32> to vector<8x32xf32>
    %52 = arith.negf %51 : vector<8x32xf32>
    %53 = math.exp %52 : vector<8x32xf32>
    %cst_18 = arith.constant 1.000000e+00 : f32
    %54 = vector.broadcast %cst_18 : f32 to vector<8x32xf32>
    %55 = arith.addf %54, %53 : vector<8x32xf32>
    %56 = arith.divf %54, %55 : vector<8x32xf32>
    %57 = vector.extract_strided_slice %44 {offsets = [0, 64], sizes = [8, 32], strides = [1, 1]} : vector<8x128xf32> to vector<8x32xf32>
    %58 = math.tanh %57 : vector<8x32xf32>
    %59 = vector.extract_strided_slice %44 {offsets = [0, 96], sizes = [8, 32], strides = [1, 1]} : vector<8x128xf32> to vector<8x32xf32>
    %60 = arith.negf %59 : vector<8x32xf32>
    %61 = math.exp %60 : vector<8x32xf32>
    %cst_19 = arith.constant 1.000000e+00 : f32
    %62 = vector.broadcast %cst_19 : f32 to vector<8x32xf32>
    %63 = arith.addf %62, %61 : vector<8x32xf32>
    %64 = arith.divf %62, %63 : vector<8x32xf32>
    %65 = arith.mulf %56, %33 : vector<8x32xf32>
    %66 = arith.mulf %50, %58 : vector<8x32xf32>
    %67 = arith.addf %65, %66 : vector<8x32xf32>
    %68 = math.tanh %67 : vector<8x32xf32>
    %69 = arith.mulf %64, %68 : vector<8x32xf32>
    %70 = arith.index_cast %c1_i32 : i32 to index
    %c0_20 = arith.constant 0 : index
    %c0_21 = arith.constant 0 : index
    %71 = vector.load %arg5[%70, %c0_20, %c0_21] : memref<8x8x32xf32, #tpu.memory_space<vmem>>, vector<1x8x32xf32>
    %72 = vector.shape_cast %71 : vector<1x8x32xf32> to vector<8x32xf32>
    %73 = vector.shape_cast %69 : vector<8x32xf32> to vector<1x8x32xf32>
    tpu.vector_store %arg5[%70, %c0_20, %c0_21], %73 {strides = array<i32>} : memref<8x8x32xf32, #tpu.memory_space<vmem>>, vector<1x8x32xf32>,
    %c2_i32 = arith.constant 2 : i32
    %74 = arith.index_cast %c2_i32 : i32 to index
    %c0_22 = arith.constant 0 : index
    %c0_23 = arith.constant 0 : index
    %75 = vector.load %arg1[%74, %c0_22, %c0_23] : memref<8x8x128xf32, #tpu.memory_space<vmem>>, vector<1x8x128xf32>
    %76 = vector.shape_cast %75 : vector<1x8x128xf32> to vector<8x128xf32>
    %cst_24 = arith.constant dense<0.000000e+00> : vector<8x128xf32>
    %77 = tpu.matmul %69, %5, %cst_24 {dimension_numbers = #tpu.dot_dimension_numbers<[1], [0], [0], [1], [0, 0, 1, 1], [], []>} : vector<8x32xf32>, vector<32x128xf32>, vector<8x128xf32> -> vector<8x128xf32>
    %78 = arith.addf %76, %77 : vector<8x128xf32>
    %79 = vector.extract_strided_slice %78 {offsets = [0, 0], sizes = [8, 32], strides = [1, 1]} : vector<8x128xf32> to vector<8x32xf32>
    %80 = arith.negf %79 : vector<8x32xf32>
    %81 = math.exp %80 : vector<8x32xf32>
    %cst_25 = arith.constant 1.000000e+00 : f32
    %82 = vector.broadcast %cst_25 : f32 to vector<8x32xf32>
    %83 = arith.addf %82, %81 : vector<8x32xf32>
    %84 = arith.divf %82, %83 : vector<8x32xf32>
    %85 = vector.extract_strided_slice %78 {offsets = [0, 32], sizes = [8, 32], strides = [1, 1]} : vector<8x128xf32> to vector<8x32xf32>
    %86 = arith.negf %85 : vector<8x32xf32>
    %87 = math.exp %86 : vector<8x32xf32>
    %cst_26 = arith.constant 1.000000e+00 : f32
    %88 = vector.broadcast %cst_26 : f32 to vector<8x32xf32>
    %89 = arith.addf %88, %87 : vector<8x32xf32>
    %90 = arith.divf %88, %89 : vector<8x32xf32>
    %91 = vector.extract_strided_slice %78 {offsets = [0, 64], sizes = [8, 32], strides = [1, 1]} : vector<8x128xf32> to vector<8x32xf32>
    %92 = math.tanh %91 : vector<8x32xf32>
    %93 = vector.extract_strided_slice %78 {offsets = [0, 96], sizes = [8, 32], strides = [1, 1]} : vector<8x128xf32> to vector<8x32xf32>
    %94 = arith.negf %93 : vector<8x32xf32>
    %95 = math.exp %94 : vector<8x32xf32>
    %cst_27 = arith.constant 1.000000e+00 : f32
    %96 = vector.broadcast %cst_27 : f32 to vector<8x32xf32>
    %97 = arith.addf %96, %95 : vector<8x32xf32>
    %98 = arith.divf %96, %97 : vector<8x32xf32>
    %99 = arith.mulf %90, %67 : vector<8x32xf32>
    %100 = arith.mulf %84, %92 : vector<8x32xf32>
    %101 = arith.addf %99, %100 : vector<8x32xf32>
    %102 = math.tanh %101 : vector<8x32xf32>
    %103 = arith.mulf %98, %102 : vector<8x32xf32>
    %104 = arith.index_cast %c2_i32 : i32 to index
    %c0_28 = arith.constant 0 : index
    %c0_29 = arith.constant 0 : index
    %105 = vector.load %arg5[%104, %c0_28, %c0_29] : memref<8x8x32xf32, #tpu.memory_space<vmem>>, vector<1x8x32xf32>
    %106 = vector.shape_cast %105 : vector<1x8x32xf32> to vector<8x32xf32>
    %107 = vector.shape_cast %103 : vector<8x32xf32> to vector<1x8x32xf32>
    tpu.vector_store %arg5[%104, %c0_28, %c0_29], %107 {strides = array<i32>} : memref<8x8x32xf32, #tpu.memory_space<vmem>>, vector<1x8x32xf32>,
    %c3_i32 = arith.constant 3 : i32
    %108 = arith.index_cast %c3_i32 : i32 to index
    %c0_30 = arith.constant 0 : index
    %c0_31 = arith.constant 0 : index
    %109 = vector.load %arg1[%108, %c0_30, %c0_31] : memref<8x8x128xf32, #tpu.memory_space<vmem>>, vector<1x8x128xf32>
    %110 = vector.shape_cast %109 : vector<1x8x128xf32> to vector<8x128xf32>
    %cst_32 = arith.constant dense<0.000000e+00> : vector<8x128xf32>
    %111 = tpu.matmul %103, %5, %cst_32 {dimension_numbers = #tpu.dot_dimension_numbers<[1], [0], [0], [1], [0, 0, 1, 1], [], []>} : vector<8x32xf32>, vector<32x128xf32>, vector<8x128xf32> -> vector<8x128xf32>
    %112 = arith.addf %110, %111 : vector<8x128xf32>
    %113 = vector.extract_strided_slice %112 {offsets = [0, 0], sizes = [8, 32], strides = [1, 1]} : vector<8x128xf32> to vector<8x32xf32>
    %114 = arith.negf %113 : vector<8x32xf32>
    %115 = math.exp %114 : vector<8x32xf32>
    %cst_33 = arith.constant 1.000000e+00 : f32
    %116 = vector.broadcast %cst_33 : f32 to vector<8x32xf32>
    %117 = arith.addf %116, %115 : vector<8x32xf32>
    %118 = arith.divf %116, %117 : vector<8x32xf32>
    %119 = vector.extract_strided_slice %112 {offsets = [0, 32], sizes = [8, 32], strides = [1, 1]} : vector<8x128xf32> to vector<8x32xf32>
    %120 = arith.negf %119 : vector<8x32xf32>
    %121 = math.exp %120 : vector<8x32xf32>
    %cst_34 = arith.constant 1.000000e+00 : f32
    %122 = vector.broadcast %cst_34 : f32 to vector<8x32xf32>
    %123 = arith.addf %122, %121 : vector<8x32xf32>
    %124 = arith.divf %122, %123 : vector<8x32xf32>
    %125 = vector.extract_strided_slice %112 {offsets = [0, 64], sizes = [8, 32], strides = [1, 1]} : vector<8x128xf32> to vector<8x32xf32>
    %126 = math.tanh %125 : vector<8x32xf32>
    %127 = vector.extract_strided_slice %112 {offsets = [0, 96], sizes = [8, 32], strides = [1, 1]} : vector<8x128xf32> to vector<8x32xf32>
    %128 = arith.negf %127 : vector<8x32xf32>
    %129 = math.exp %128 : vector<8x32xf32>
    %cst_35 = arith.constant 1.000000e+00 : f32
    %130 = vector.broadcast %cst_35 : f32 to vector<8x32xf32>
    %131 = arith.addf %130, %129 : vector<8x32xf32>
    %132 = arith.divf %130, %131 : vector<8x32xf32>
    %133 = arith.mulf %124, %101 : vector<8x32xf32>
    %134 = arith.mulf %118, %126 : vector<8x32xf32>
    %135 = arith.addf %133, %134 : vector<8x32xf32>
    %136 = math.tanh %135 : vector<8x32xf32>
    %137 = arith.mulf %132, %136 : vector<8x32xf32>
    %138 = arith.index_cast %c3_i32 : i32 to index
    %c0_36 = arith.constant 0 : index
    %c0_37 = arith.constant 0 : index
    %139 = vector.load %arg5[%138, %c0_36, %c0_37] : memref<8x8x32xf32, #tpu.memory_space<vmem>>, vector<1x8x32xf32>
    %140 = vector.shape_cast %139 : vector<1x8x32xf32> to vector<8x32xf32>
    %141 = vector.shape_cast %137 : vector<8x32xf32> to vector<1x8x32xf32>
    tpu.vector_store %arg5[%138, %c0_36, %c0_37], %141 {strides = array<i32>} : memref<8x8x32xf32, #tpu.memory_space<vmem>>, vector<1x8x32xf32>,
    %c4_i32 = arith.constant 4 : i32
    %142 = arith.index_cast %c4_i32 : i32 to index
    %c0_38 = arith.constant 0 : index
    %c0_39 = arith.constant 0 : index
    %143 = vector.load %arg1[%142, %c0_38, %c0_39] : memref<8x8x128xf32, #tpu.memory_space<vmem>>, vector<1x8x128xf32>
    %144 = vector.shape_cast %143 : vector<1x8x128xf32> to vector<8x128xf32>
    %cst_40 = arith.constant dense<0.000000e+00> : vector<8x128xf32>
    %145 = tpu.matmul %137, %5, %cst_40 {dimension_numbers = #tpu.dot_dimension_numbers<[1], [0], [0], [1], [0, 0, 1, 1], [], []>} : vector<8x32xf32>, vector<32x128xf32>, vector<8x128xf32> -> vector<8x128xf32>
    %146 = arith.addf %144, %145 : vector<8x128xf32>
    %147 = vector.extract_strided_slice %146 {offsets = [0, 0], sizes = [8, 32], strides = [1, 1]} : vector<8x128xf32> to vector<8x32xf32>
    %148 = arith.negf %147 : vector<8x32xf32>
    %149 = math.exp %148 : vector<8x32xf32>
    %cst_41 = arith.constant 1.000000e+00 : f32
    %150 = vector.broadcast %cst_41 : f32 to vector<8x32xf32>
    %151 = arith.addf %150, %149 : vector<8x32xf32>
    %152 = arith.divf %150, %151 : vector<8x32xf32>
    %153 = vector.extract_strided_slice %146 {offsets = [0, 32], sizes = [8, 32], strides = [1, 1]} : vector<8x128xf32> to vector<8x32xf32>
    %154 = arith.negf %153 : vector<8x32xf32>
    %155 = math.exp %154 : vector<8x32xf32>
    %cst_42 = arith.constant 1.000000e+00 : f32
    %156 = vector.broadcast %cst_42 : f32 to vector<8x32xf32>
    %157 = arith.addf %156, %155 : vector<8x32xf32>
    %158 = arith.divf %156, %157 : vector<8x32xf32>
    %159 = vector.extract_strided_slice %146 {offsets = [0, 64], sizes = [8, 32], strides = [1, 1]} : vector<8x128xf32> to vector<8x32xf32>
    %160 = math.tanh %159 : vector<8x32xf32>
    %161 = vector.extract_strided_slice %146 {offsets = [0, 96], sizes = [8, 32], strides = [1, 1]} : vector<8x128xf32> to vector<8x32xf32>
    %162 = arith.negf %161 : vector<8x32xf32>
    %163 = math.exp %162 : vector<8x32xf32>
    %cst_43 = arith.constant 1.000000e+00 : f32
    %164 = vector.broadcast %cst_43 : f32 to vector<8x32xf32>
    %165 = arith.addf %164, %163 : vector<8x32xf32>
    %166 = arith.divf %164, %165 : vector<8x32xf32>
    %167 = arith.mulf %158, %135 : vector<8x32xf32>
    %168 = arith.mulf %152, %160 : vector<8x32xf32>
    %169 = arith.addf %167, %168 : vector<8x32xf32>
    %170 = math.tanh %169 : vector<8x32xf32>
    %171 = arith.mulf %166, %170 : vector<8x32xf32>
    %172 = arith.index_cast %c4_i32 : i32 to index
    %c0_44 = arith.constant 0 : index
    %c0_45 = arith.constant 0 : index
    %173 = vector.load %arg5[%172, %c0_44, %c0_45] : memref<8x8x32xf32, #tpu.memory_space<vmem>>, vector<1x8x32xf32>
    %174 = vector.shape_cast %173 : vector<1x8x32xf32> to vector<8x32xf32>
    %175 = vector.shape_cast %171 : vector<8x32xf32> to vector<1x8x32xf32>
    tpu.vector_store %arg5[%172, %c0_44, %c0_45], %175 {strides = array<i32>} : memref<8x8x32xf32, #tpu.memory_space<vmem>>, vector<1x8x32xf32>,
    %c5_i32 = arith.constant 5 : i32
    %176 = arith.index_cast %c5_i32 : i32 to index
    %c0_46 = arith.constant 0 : index
    %c0_47 = arith.constant 0 : index
    %177 = vector.load %arg1[%176, %c0_46, %c0_47] : memref<8x8x128xf32, #tpu.memory_space<vmem>>, vector<1x8x128xf32>
    %178 = vector.shape_cast %177 : vector<1x8x128xf32> to vector<8x128xf32>
    %cst_48 = arith.constant dense<0.000000e+00> : vector<8x128xf32>
    %179 = tpu.matmul %171, %5, %cst_48 {dimension_numbers = #tpu.dot_dimension_numbers<[1], [0], [0], [1], [0, 0, 1, 1], [], []>} : vector<8x32xf32>, vector<32x128xf32>, vector<8x128xf32> -> vector<8x128xf32>
    %180 = arith.addf %178, %179 : vector<8x128xf32>
    %181 = vector.extract_strided_slice %180 {offsets = [0, 0], sizes = [8, 32], strides = [1, 1]} : vector<8x128xf32> to vector<8x32xf32>
    %182 = arith.negf %181 : vector<8x32xf32>
    %183 = math.exp %182 : vector<8x32xf32>
    %cst_49 = arith.constant 1.000000e+00 : f32
    %184 = vector.broadcast %cst_49 : f32 to vector<8x32xf32>
    %185 = arith.addf %184, %183 : vector<8x32xf32>
    %186 = arith.divf %184, %185 : vector<8x32xf32>
    %187 = vector.extract_strided_slice %180 {offsets = [0, 32], sizes = [8, 32], strides = [1, 1]} : vector<8x128xf32> to vector<8x32xf32>
    %188 = arith.negf %187 : vector<8x32xf32>
    %189 = math.exp %188 : vector<8x32xf32>
    %cst_50 = arith.constant 1.000000e+00 : f32
    %190 = vector.broadcast %cst_50 : f32 to vector<8x32xf32>
    %191 = arith.addf %190, %189 : vector<8x32xf32>
    %192 = arith.divf %190, %191 : vector<8x32xf32>
    %193 = vector.extract_strided_slice %180 {offsets = [0, 64], sizes = [8, 32], strides = [1, 1]} : vector<8x128xf32> to vector<8x32xf32>
    %194 = math.tanh %193 : vector<8x32xf32>
    %195 = vector.extract_strided_slice %180 {offsets = [0, 96], sizes = [8, 32], strides = [1, 1]} : vector<8x128xf32> to vector<8x32xf32>
    %196 = arith.negf %195 : vector<8x32xf32>
    %197 = math.exp %196 : vector<8x32xf32>
    %cst_51 = arith.constant 1.000000e+00 : f32
    %198 = vector.broadcast %cst_51 : f32 to vector<8x32xf32>
    %199 = arith.addf %198, %197 : vector<8x32xf32>
    %200 = arith.divf %198, %199 : vector<8x32xf32>
    %201 = arith.mulf %192, %169 : vector<8x32xf32>
    %202 = arith.mulf %186, %194 : vector<8x32xf32>
    %203 = arith.addf %201, %202 : vector<8x32xf32>
    %204 = math.tanh %203 : vector<8x32xf32>
    %205 = arith.mulf %200, %204 : vector<8x32xf32>
    %206 = arith.index_cast %c5_i32 : i32 to index
    %c0_52 = arith.constant 0 : index
    %c0_53 = arith.constant 0 : index
    %207 = vector.load %arg5[%206, %c0_52, %c0_53] : memref<8x8x32xf32, #tpu.memory_space<vmem>>, vector<1x8x32xf32>
    %208 = vector.shape_cast %207 : vector<1x8x32xf32> to vector<8x32xf32>
    %209 = vector.shape_cast %205 : vector<8x32xf32> to vector<1x8x32xf32>
    tpu.vector_store %arg5[%206, %c0_52, %c0_53], %209 {strides = array<i32>} : memref<8x8x32xf32, #tpu.memory_space<vmem>>, vector<1x8x32xf32>,
    %c6_i32 = arith.constant 6 : i32
    %210 = arith.index_cast %c6_i32 : i32 to index
    %c0_54 = arith.constant 0 : index
    %c0_55 = arith.constant 0 : index
    %211 = vector.load %arg1[%210, %c0_54, %c0_55] : memref<8x8x128xf32, #tpu.memory_space<vmem>>, vector<1x8x128xf32>
    %212 = vector.shape_cast %211 : vector<1x8x128xf32> to vector<8x128xf32>
    %cst_56 = arith.constant dense<0.000000e+00> : vector<8x128xf32>
    %213 = tpu.matmul %205, %5, %cst_56 {dimension_numbers = #tpu.dot_dimension_numbers<[1], [0], [0], [1], [0, 0, 1, 1], [], []>} : vector<8x32xf32>, vector<32x128xf32>, vector<8x128xf32> -> vector<8x128xf32>
    %214 = arith.addf %212, %213 : vector<8x128xf32>
    %215 = vector.extract_strided_slice %214 {offsets = [0, 0], sizes = [8, 32], strides = [1, 1]} : vector<8x128xf32> to vector<8x32xf32>
    %216 = arith.negf %215 : vector<8x32xf32>
    %217 = math.exp %216 : vector<8x32xf32>
    %cst_57 = arith.constant 1.000000e+00 : f32
    %218 = vector.broadcast %cst_57 : f32 to vector<8x32xf32>
    %219 = arith.addf %218, %217 : vector<8x32xf32>
    %220 = arith.divf %218, %219 : vector<8x32xf32>
    %221 = vector.extract_strided_slice %214 {offsets = [0, 32], sizes = [8, 32], strides = [1, 1]} : vector<8x128xf32> to vector<8x32xf32>
    %222 = arith.negf %221 : vector<8x32xf32>
    %223 = math.exp %222 : vector<8x32xf32>
    %cst_58 = arith.constant 1.000000e+00 : f32
    %224 = vector.broadcast %cst_58 : f32 to vector<8x32xf32>
    %225 = arith.addf %224, %223 : vector<8x32xf32>
    %226 = arith.divf %224, %225 : vector<8x32xf32>
    %227 = vector.extract_strided_slice %214 {offsets = [0, 64], sizes = [8, 32], strides = [1, 1]} : vector<8x128xf32> to vector<8x32xf32>
    %228 = math.tanh %227 : vector<8x32xf32>
    %229 = vector.extract_strided_slice %214 {offsets = [0, 96], sizes = [8, 32], strides = [1, 1]} : vector<8x128xf32> to vector<8x32xf32>
    %230 = arith.negf %229 : vector<8x32xf32>
    %231 = math.exp %230 : vector<8x32xf32>
    %cst_59 = arith.constant 1.000000e+00 : f32
    %232 = vector.broadcast %cst_59 : f32 to vector<8x32xf32>
    %233 = arith.addf %232, %231 : vector<8x32xf32>
    %234 = arith.divf %232, %233 : vector<8x32xf32>
    %235 = arith.mulf %226, %203 : vector<8x32xf32>
    %236 = arith.mulf %220, %228 : vector<8x32xf32>
    %237 = arith.addf %235, %236 : vector<8x32xf32>
    %238 = math.tanh %237 : vector<8x32xf32>
    %239 = arith.mulf %234, %238 : vector<8x32xf32>
    %240 = arith.index_cast %c6_i32 : i32 to index
    %c0_60 = arith.constant 0 : index
    %c0_61 = arith.constant 0 : index
    %241 = vector.load %arg5[%240, %c0_60, %c0_61] : memref<8x8x32xf32, #tpu.memory_space<vmem>>, vector<1x8x32xf32>
    %242 = vector.shape_cast %241 : vector<1x8x32xf32> to vector<8x32xf32>
    %243 = vector.shape_cast %239 : vector<8x32xf32> to vector<1x8x32xf32>
    tpu.vector_store %arg5[%240, %c0_60, %c0_61], %243 {strides = array<i32>} : memref<8x8x32xf32, #tpu.memory_space<vmem>>, vector<1x8x32xf32>,
    %c7_i32 = arith.constant 7 : i32
    %244 = arith.index_cast %c7_i32 : i32 to index
    %c0_62 = arith.constant 0 : index
    %c0_63 = arith.constant 0 : index
    %245 = vector.load %arg1[%244, %c0_62, %c0_63] : memref<8x8x128xf32, #tpu.memory_space<vmem>>, vector<1x8x128xf32>
    %246 = vector.shape_cast %245 : vector<1x8x128xf32> to vector<8x128xf32>
    %cst_64 = arith.constant dense<0.000000e+00> : vector<8x128xf32>
    %247 = tpu.matmul %239, %5, %cst_64 {dimension_numbers = #tpu.dot_dimension_numbers<[1], [0], [0], [1], [0, 0, 1, 1], [], []>} : vector<8x32xf32>, vector<32x128xf32>, vector<8x128xf32> -> vector<8x128xf32>
    %248 = arith.addf %246, %247 : vector<8x128xf32>
    %249 = vector.extract_strided_slice %248 {offsets = [0, 0], sizes = [8, 32], strides = [1, 1]} : vector<8x128xf32> to vector<8x32xf32>
    %250 = arith.negf %249 : vector<8x32xf32>
    %251 = math.exp %250 : vector<8x32xf32>
    %cst_65 = arith.constant 1.000000e+00 : f32
    %252 = vector.broadcast %cst_65 : f32 to vector<8x32xf32>
    %253 = arith.addf %252, %251 : vector<8x32xf32>
    %254 = arith.divf %252, %253 : vector<8x32xf32>
    %255 = vector.extract_strided_slice %248 {offsets = [0, 32], sizes = [8, 32], strides = [1, 1]} : vector<8x128xf32> to vector<8x32xf32>
    %256 = arith.negf %255 : vector<8x32xf32>
    %257 = math.exp %256 : vector<8x32xf32>
    %cst_66 = arith.constant 1.000000e+00 : f32
    %258 = vector.broadcast %cst_66 : f32 to vector<8x32xf32>
    %259 = arith.addf %258, %257 : vector<8x32xf32>
    %260 = arith.divf %258, %259 : vector<8x32xf32>
    %261 = vector.extract_strided_slice %248 {offsets = [0, 64], sizes = [8, 32], strides = [1, 1]} : vector<8x128xf32> to vector<8x32xf32>
    %262 = math.tanh %261 : vector<8x32xf32>
    %263 = vector.extract_strided_slice %248 {offsets = [0, 96], sizes = [8, 32], strides = [1, 1]} : vector<8x128xf32> to vector<8x32xf32>
    %264 = arith.negf %263 : vector<8x32xf32>
    %265 = math.exp %264 : vector<8x32xf32>
    %cst_67 = arith.constant 1.000000e+00 : f32
    %266 = vector.broadcast %cst_67 : f32 to vector<8x32xf32>
    %267 = arith.addf %266, %265 : vector<8x32xf32>
    %268 = arith.divf %266, %267 : vector<8x32xf32>
    %269 = arith.mulf %260, %237 : vector<8x32xf32>
    %270 = arith.mulf %254, %262 : vector<8x32xf32>
    %271 = arith.addf %269, %270 : vector<8x32xf32>
    %272 = math.tanh %271 : vector<8x32xf32>
    %273 = arith.mulf %268, %272 : vector<8x32xf32>
    %274 = arith.index_cast %c7_i32 : i32 to index
    %c0_68 = arith.constant 0 : index
    %c0_69 = arith.constant 0 : index
    %275 = vector.load %arg5[%274, %c0_68, %c0_69] : memref<8x8x32xf32, #tpu.memory_space<vmem>>, vector<1x8x32xf32>
    %276 = vector.shape_cast %275 : vector<1x8x32xf32> to vector<8x32xf32>
    %277 = vector.shape_cast %273 : vector<8x32xf32> to vector<1x8x32xf32>
    tpu.vector_store %arg5[%274, %c0_68, %c0_69], %277 {strides = array<i32>} : memref<8x8x32xf32, #tpu.memory_space<vmem>>, vector<1x8x32xf32>,
    %c8_i32 = arith.constant 8 : i32
    %c0_70 = arith.constant 0 : index
    %c0_71 = arith.constant 0 : index
    %278 = vector.load %arg8[%c0_70, %c0_71] : memref<8x32xf32, #tpu.memory_space<vmem>>, vector<8x32xf32>
    tpu.vector_store %arg8[%c0_70, %c0_71], %273 {strides = array<i32>} : memref<8x32xf32, #tpu.memory_space<vmem>>, vector<8x32xf32>,
    %c0_72 = arith.constant 0 : index
    %c0_73 = arith.constant 0 : index
    %279 = vector.load %arg9[%c0_72, %c0_73] : memref<8x32xf32, #tpu.memory_space<vmem>>, vector<8x32xf32>
    tpu.vector_store %arg9[%c0_72, %c0_73], %271 {strides = array<i32>} : memref<8x32xf32, #tpu.memory_space<vmem>>, vector<8x32xf32>,
    %c0_74 = arith.constant 0 : index
    %c0_75 = arith.constant 0 : index
    %280 = vector.load %arg6[%c0_74, %c0_75] : memref<8x32xf32, #tpu.memory_space<vmem>>, vector<8x32xf32>
    tpu.vector_store %arg6[%c0_74, %c0_75], %273 {strides = array<i32>} : memref<8x32xf32, #tpu.memory_space<vmem>>, vector<8x32xf32>,
    %c0_76 = arith.constant 0 : index
    %c0_77 = arith.constant 0 : index
    %281 = vector.load %arg7[%c0_76, %c0_77] : memref<8x32xf32, #tpu.memory_space<vmem>>, vector<8x32xf32>
    tpu.vector_store %arg7[%c0_76, %c0_77], %271 {strides = array<i32>} : memref<8x32xf32, #tpu.memory_space<vmem>>, vector<8x32xf32>,
    return
  }
  func.func @transform_0(%arg0: i32) -> (i32, i32, i32) {
    %c0_i32 = arith.constant 0 : i32
    %c0_i32_0 = arith.constant 0 : i32
    %c0_i32_1 = arith.constant 0 : i32
    return %arg0, %c0_i32, %c0_i32_0 : i32, i32, i32
  }
  func.func @transform_1(%arg0: i32) -> (i32, i32) {
    %c0_i32 = arith.constant 0 : i32
    %c0_i32_0 = arith.constant 0 : i32
    %c0_i32_1 = arith.constant 0 : i32
    return %c0_i32, %c0_i32_0 : i32, i32
  }
  func.func @transform_2(%arg0: i32) -> (i32, i32) {
    %c0_i32 = arith.constant 0 : i32
    %c0_i32_0 = arith.constant 0 : i32
    %c0_i32_1 = arith.constant 0 : i32
    return %c0_i32, %c0_i32_0 : i32, i32
  }
  func.func @transform_3(%arg0: i32) -> (i32, i32) {
    %c0_i32 = arith.constant 0 : i32
    %c0_i32_0 = arith.constant 0 : i32
    %c0_i32_1 = arith.constant 0 : i32
    return %c0_i32, %c0_i32_0 : i32, i32
  }
  func.func @transform_4(%arg0: i32) -> (i32, i32, i32) {
    %c0_i32 = arith.constant 0 : i32
    %c0_i32_0 = arith.constant 0 : i32
    %c0_i32_1 = arith.constant 0 : i32
    return %arg0, %c0_i32, %c0_i32_0 : i32, i32, i32
  }
  func.func @transform_5(%arg0: i32) -> (i32, i32) {
    %c0_i32 = arith.constant 0 : i32
    %c0_i32_0 = arith.constant 0 : i32
    %c0_i32_1 = arith.constant 0 : i32
    return %c0_i32, %c0_i32_0 : i32, i32
  }
  func.func @transform_6(%arg0: i32) -> (i32, i32) {
    %c0_i32 = arith.constant 0 : i32
    %c0_i32_0 = arith.constant 0 : i32
    %c0_i32_1 = arith.constant 0 : i32
    return %c0_i32, %c0_i32_0 : i32, i32
  }
}

module attributes {stable_mosaic.version = 11 : i64} {
  func.func @_lstm_last_fc_kernel(%arg0: i32, %arg1: memref<8x8x128xf32, #tpu.memory_space<vmem>>, %arg2: memref<8x32xf32, #tpu.memory_space<vmem>>, %arg3: memref<8x32xf32, #tpu.memory_space<vmem>>, %arg4: memref<32x128xf32, #tpu.memory_space<vmem>>, %arg5: memref<32x4xf32, #tpu.memory_space<vmem>>, %arg6: memref<1x4xf32, #tpu.memory_space<vmem>>, %arg7: memref<8x4xf32, #tpu.memory_space<vmem>>, %arg8: memref<8x32xf32, #tpu.memory_space<vmem>>, %arg9: memref<8x32xf32, #tpu.memory_space<vmem>>, %arg10: memref<8x32xf32, #tpu.memory_space<vmem>>, %arg11: memref<8x32xf32, #tpu.memory_space<vmem>>) attributes {dimension_semantics = [#tpu.dimension_semantics<arbitrary>], iteration_bounds = array<i64: 1>, scalar_prefetch = 0 : i64, scratch_operands = 2 : i64, tpu.core_type = #tpu.core_type<tc>, window_params = [{transform_indices = @transform_0, window_bounds = array<i64: 8, 8, 128>}, {pipeline_mode = #tpu.pipeline_mode<synchronous>, transform_indices = @transform_1, window_bounds = array<i64: 8, 32>}, {pipeline_mode = #tpu.pipeline_mode<synchronous>, transform_indices = @transform_2, window_bounds = array<i64: 8, 32>}, {pipeline_mode = #tpu.pipeline_mode<synchronous>, transform_indices = @transform_3, window_bounds = array<i64: 32, 128>}, {pipeline_mode = #tpu.pipeline_mode<synchronous>, transform_indices = @transform_4, window_bounds = array<i64: 32, 4>}, {pipeline_mode = #tpu.pipeline_mode<synchronous>, transform_indices = @transform_5, window_bounds = array<i64: 1, 4>}, {pipeline_mode = #tpu.pipeline_mode<synchronous>, transform_indices = @transform_6, window_bounds = array<i64: 8, 4>}, {pipeline_mode = #tpu.pipeline_mode<synchronous>, transform_indices = @transform_7, window_bounds = array<i64: 8, 32>}, {pipeline_mode = #tpu.pipeline_mode<synchronous>, transform_indices = @transform_8, window_bounds = array<i64: 8, 32>}]} {
    %c0_i32 = arith.constant 0 : i32
    %0 = arith.cmpi eq, %arg0, %c0_i32 : i32
    %1 = arith.extui %0 : i1 to i32
    %c0_i32_0 = arith.constant 0 : i32
    %2 = arith.cmpi ne, %1, %c0_i32_0 : i32
    scf.if %2 {
      %c0_64 = arith.constant 0 : index
      %c0_65 = arith.constant 0 : index
      %253 = vector.load %arg2[%c0_64, %c0_65] : memref<8x32xf32, #tpu.memory_space<vmem>>, vector<8x32xf32>
      %c0_66 = arith.constant 0 : index
      %c0_67 = arith.constant 0 : index
      %254 = vector.load %arg10[%c0_66, %c0_67] : memref<8x32xf32, #tpu.memory_space<vmem>>, vector<8x32xf32>
      tpu.vector_store %arg10[%c0_66, %c0_67], %253 {strides = array<i32>} : memref<8x32xf32, #tpu.memory_space<vmem>>, vector<8x32xf32>,
      %c0_68 = arith.constant 0 : index
      %c0_69 = arith.constant 0 : index
      %255 = vector.load %arg3[%c0_68, %c0_69] : memref<8x32xf32, #tpu.memory_space<vmem>>, vector<8x32xf32>
      %c0_70 = arith.constant 0 : index
      %c0_71 = arith.constant 0 : index
      %256 = vector.load %arg11[%c0_70, %c0_71] : memref<8x32xf32, #tpu.memory_space<vmem>>, vector<8x32xf32>
      tpu.vector_store %arg11[%c0_70, %c0_71], %255 {strides = array<i32>} : memref<8x32xf32, #tpu.memory_space<vmem>>, vector<8x32xf32>,
    } else {
    }
    %c0 = arith.constant 0 : index
    %c0_1 = arith.constant 0 : index
    %3 = vector.load %arg10[%c0, %c0_1] : memref<8x32xf32, #tpu.memory_space<vmem>>, vector<8x32xf32>
    %c0_2 = arith.constant 0 : index
    %c0_3 = arith.constant 0 : index
    %4 = vector.load %arg11[%c0_2, %c0_3] : memref<8x32xf32, #tpu.memory_space<vmem>>, vector<8x32xf32>
    %c0_4 = arith.constant 0 : index
    %c0_5 = arith.constant 0 : index
    %5 = vector.load %arg4[%c0_4, %c0_5] : memref<32x128xf32, #tpu.memory_space<vmem>>, vector<32x128xf32>
    %c0_i32_6 = arith.constant 0 : i32
    %6 = arith.index_cast %c0_i32_6 : i32 to index
    %c0_7 = arith.constant 0 : index
    %c0_8 = arith.constant 0 : index
    %7 = vector.load %arg1[%6, %c0_7, %c0_8] : memref<8x8x128xf32, #tpu.memory_space<vmem>>, vector<1x8x128xf32>
    %8 = vector.shape_cast %7 : vector<1x8x128xf32> to vector<8x128xf32>
    %cst = arith.constant dense<0.000000e+00> : vector<8x128xf32>
    %9 = tpu.matmul %3, %5, %cst {dimension_numbers = #tpu.dot_dimension_numbers<[1], [0], [0], [1], [0, 0, 1, 1], [], []>} : vector<8x32xf32>, vector<32x128xf32>, vector<8x128xf32> -> vector<8x128xf32>
    %10 = arith.addf %8, %9 : vector<8x128xf32>
    %11 = vector.extract_strided_slice %10 {offsets = [0, 0], sizes = [8, 32], strides = [1, 1]} : vector<8x128xf32> to vector<8x32xf32>
    %12 = arith.negf %11 : vector<8x32xf32>
    %13 = math.exp %12 : vector<8x32xf32>
    %cst_9 = arith.constant 1.000000e+00 : f32
    %14 = vector.broadcast %cst_9 : f32 to vector<8x32xf32>
    %15 = arith.addf %14, %13 : vector<8x32xf32>
    %16 = arith.divf %14, %15 : vector<8x32xf32>
    %17 = vector.extract_strided_slice %10 {offsets = [0, 32], sizes = [8, 32], strides = [1, 1]} : vector<8x128xf32> to vector<8x32xf32>
    %18 = arith.negf %17 : vector<8x32xf32>
    %19 = math.exp %18 : vector<8x32xf32>
    %cst_10 = arith.constant 1.000000e+00 : f32
    %20 = vector.broadcast %cst_10 : f32 to vector<8x32xf32>
    %21 = arith.addf %20, %19 : vector<8x32xf32>
    %22 = arith.divf %20, %21 : vector<8x32xf32>
    %23 = vector.extract_strided_slice %10 {offsets = [0, 64], sizes = [8, 32], strides = [1, 1]} : vector<8x128xf32> to vector<8x32xf32>
    %24 = math.tanh %23 : vector<8x32xf32>
    %25 = vector.extract_strided_slice %10 {offsets = [0, 96], sizes = [8, 32], strides = [1, 1]} : vector<8x128xf32> to vector<8x32xf32>
    %26 = arith.negf %25 : vector<8x32xf32>
    %27 = math.exp %26 : vector<8x32xf32>
    %cst_11 = arith.constant 1.000000e+00 : f32
    %28 = vector.broadcast %cst_11 : f32 to vector<8x32xf32>
    %29 = arith.addf %28, %27 : vector<8x32xf32>
    %30 = arith.divf %28, %29 : vector<8x32xf32>
    %31 = arith.mulf %22, %4 : vector<8x32xf32>
    %32 = arith.mulf %16, %24 : vector<8x32xf32>
    %33 = arith.addf %31, %32 : vector<8x32xf32>
    %34 = math.tanh %33 : vector<8x32xf32>
    %35 = arith.mulf %30, %34 : vector<8x32xf32>
    %c1_i32 = arith.constant 1 : i32
    %36 = arith.index_cast %c1_i32 : i32 to index
    %c0_12 = arith.constant 0 : index
    %c0_13 = arith.constant 0 : index
    %37 = vector.load %arg1[%36, %c0_12, %c0_13] : memref<8x8x128xf32, #tpu.memory_space<vmem>>, vector<1x8x128xf32>
    %38 = vector.shape_cast %37 : vector<1x8x128xf32> to vector<8x128xf32>
    %cst_14 = arith.constant dense<0.000000e+00> : vector<8x128xf32>
    %39 = tpu.matmul %35, %5, %cst_14 {dimension_numbers = #tpu.dot_dimension_numbers<[1], [0], [0], [1], [0, 0, 1, 1], [], []>} : vector<8x32xf32>, vector<32x128xf32>, vector<8x128xf32> -> vector<8x128xf32>
    %40 = arith.addf %38, %39 : vector<8x128xf32>
    %41 = vector.extract_strided_slice %40 {offsets = [0, 0], sizes = [8, 32], strides = [1, 1]} : vector<8x128xf32> to vector<8x32xf32>
    %42 = arith.negf %41 : vector<8x32xf32>
    %43 = math.exp %42 : vector<8x32xf32>
    %cst_15 = arith.constant 1.000000e+00 : f32
    %44 = vector.broadcast %cst_15 : f32 to vector<8x32xf32>
    %45 = arith.addf %44, %43 : vector<8x32xf32>
    %46 = arith.divf %44, %45 : vector<8x32xf32>
    %47 = vector.extract_strided_slice %40 {offsets = [0, 32], sizes = [8, 32], strides = [1, 1]} : vector<8x128xf32> to vector<8x32xf32>
    %48 = arith.negf %47 : vector<8x32xf32>
    %49 = math.exp %48 : vector<8x32xf32>
    %cst_16 = arith.constant 1.000000e+00 : f32
    %50 = vector.broadcast %cst_16 : f32 to vector<8x32xf32>
    %51 = arith.addf %50, %49 : vector<8x32xf32>
    %52 = arith.divf %50, %51 : vector<8x32xf32>
    %53 = vector.extract_strided_slice %40 {offsets = [0, 64], sizes = [8, 32], strides = [1, 1]} : vector<8x128xf32> to vector<8x32xf32>
    %54 = math.tanh %53 : vector<8x32xf32>
    %55 = vector.extract_strided_slice %40 {offsets = [0, 96], sizes = [8, 32], strides = [1, 1]} : vector<8x128xf32> to vector<8x32xf32>
    %56 = arith.negf %55 : vector<8x32xf32>
    %57 = math.exp %56 : vector<8x32xf32>
    %cst_17 = arith.constant 1.000000e+00 : f32
    %58 = vector.broadcast %cst_17 : f32 to vector<8x32xf32>
    %59 = arith.addf %58, %57 : vector<8x32xf32>
    %60 = arith.divf %58, %59 : vector<8x32xf32>
    %61 = arith.mulf %52, %33 : vector<8x32xf32>
    %62 = arith.mulf %46, %54 : vector<8x32xf32>
    %63 = arith.addf %61, %62 : vector<8x32xf32>
    %64 = math.tanh %63 : vector<8x32xf32>
    %65 = arith.mulf %60, %64 : vector<8x32xf32>
    %c2_i32 = arith.constant 2 : i32
    %66 = arith.index_cast %c2_i32 : i32 to index
    %c0_18 = arith.constant 0 : index
    %c0_19 = arith.constant 0 : index
    %67 = vector.load %arg1[%66, %c0_18, %c0_19] : memref<8x8x128xf32, #tpu.memory_space<vmem>>, vector<1x8x128xf32>
    %68 = vector.shape_cast %67 : vector<1x8x128xf32> to vector<8x128xf32>
    %cst_20 = arith.constant dense<0.000000e+00> : vector<8x128xf32>
    %69 = tpu.matmul %65, %5, %cst_20 {dimension_numbers = #tpu.dot_dimension_numbers<[1], [0], [0], [1], [0, 0, 1, 1], [], []>} : vector<8x32xf32>, vector<32x128xf32>, vector<8x128xf32> -> vector<8x128xf32>
    %70 = arith.addf %68, %69 : vector<8x128xf32>
    %71 = vector.extract_strided_slice %70 {offsets = [0, 0], sizes = [8, 32], strides = [1, 1]} : vector<8x128xf32> to vector<8x32xf32>
    %72 = arith.negf %71 : vector<8x32xf32>
    %73 = math.exp %72 : vector<8x32xf32>
    %cst_21 = arith.constant 1.000000e+00 : f32
    %74 = vector.broadcast %cst_21 : f32 to vector<8x32xf32>
    %75 = arith.addf %74, %73 : vector<8x32xf32>
    %76 = arith.divf %74, %75 : vector<8x32xf32>
    %77 = vector.extract_strided_slice %70 {offsets = [0, 32], sizes = [8, 32], strides = [1, 1]} : vector<8x128xf32> to vector<8x32xf32>
    %78 = arith.negf %77 : vector<8x32xf32>
    %79 = math.exp %78 : vector<8x32xf32>
    %cst_22 = arith.constant 1.000000e+00 : f32
    %80 = vector.broadcast %cst_22 : f32 to vector<8x32xf32>
    %81 = arith.addf %80, %79 : vector<8x32xf32>
    %82 = arith.divf %80, %81 : vector<8x32xf32>
    %83 = vector.extract_strided_slice %70 {offsets = [0, 64], sizes = [8, 32], strides = [1, 1]} : vector<8x128xf32> to vector<8x32xf32>
    %84 = math.tanh %83 : vector<8x32xf32>
    %85 = vector.extract_strided_slice %70 {offsets = [0, 96], sizes = [8, 32], strides = [1, 1]} : vector<8x128xf32> to vector<8x32xf32>
    %86 = arith.negf %85 : vector<8x32xf32>
    %87 = math.exp %86 : vector<8x32xf32>
    %cst_23 = arith.constant 1.000000e+00 : f32
    %88 = vector.broadcast %cst_23 : f32 to vector<8x32xf32>
    %89 = arith.addf %88, %87 : vector<8x32xf32>
    %90 = arith.divf %88, %89 : vector<8x32xf32>
    %91 = arith.mulf %82, %63 : vector<8x32xf32>
    %92 = arith.mulf %76, %84 : vector<8x32xf32>
    %93 = arith.addf %91, %92 : vector<8x32xf32>
    %94 = math.tanh %93 : vector<8x32xf32>
    %95 = arith.mulf %90, %94 : vector<8x32xf32>
    %c3_i32 = arith.constant 3 : i32
    %96 = arith.index_cast %c3_i32 : i32 to index
    %c0_24 = arith.constant 0 : index
    %c0_25 = arith.constant 0 : index
    %97 = vector.load %arg1[%96, %c0_24, %c0_25] : memref<8x8x128xf32, #tpu.memory_space<vmem>>, vector<1x8x128xf32>
    %98 = vector.shape_cast %97 : vector<1x8x128xf32> to vector<8x128xf32>
    %cst_26 = arith.constant dense<0.000000e+00> : vector<8x128xf32>
    %99 = tpu.matmul %95, %5, %cst_26 {dimension_numbers = #tpu.dot_dimension_numbers<[1], [0], [0], [1], [0, 0, 1, 1], [], []>} : vector<8x32xf32>, vector<32x128xf32>, vector<8x128xf32> -> vector<8x128xf32>
    %100 = arith.addf %98, %99 : vector<8x128xf32>
    %101 = vector.extract_strided_slice %100 {offsets = [0, 0], sizes = [8, 32], strides = [1, 1]} : vector<8x128xf32> to vector<8x32xf32>
    %102 = arith.negf %101 : vector<8x32xf32>
    %103 = math.exp %102 : vector<8x32xf32>
    %cst_27 = arith.constant 1.000000e+00 : f32
    %104 = vector.broadcast %cst_27 : f32 to vector<8x32xf32>
    %105 = arith.addf %104, %103 : vector<8x32xf32>
    %106 = arith.divf %104, %105 : vector<8x32xf32>
    %107 = vector.extract_strided_slice %100 {offsets = [0, 32], sizes = [8, 32], strides = [1, 1]} : vector<8x128xf32> to vector<8x32xf32>
    %108 = arith.negf %107 : vector<8x32xf32>
    %109 = math.exp %108 : vector<8x32xf32>
    %cst_28 = arith.constant 1.000000e+00 : f32
    %110 = vector.broadcast %cst_28 : f32 to vector<8x32xf32>
    %111 = arith.addf %110, %109 : vector<8x32xf32>
    %112 = arith.divf %110, %111 : vector<8x32xf32>
    %113 = vector.extract_strided_slice %100 {offsets = [0, 64], sizes = [8, 32], strides = [1, 1]} : vector<8x128xf32> to vector<8x32xf32>
    %114 = math.tanh %113 : vector<8x32xf32>
    %115 = vector.extract_strided_slice %100 {offsets = [0, 96], sizes = [8, 32], strides = [1, 1]} : vector<8x128xf32> to vector<8x32xf32>
    %116 = arith.negf %115 : vector<8x32xf32>
    %117 = math.exp %116 : vector<8x32xf32>
    %cst_29 = arith.constant 1.000000e+00 : f32
    %118 = vector.broadcast %cst_29 : f32 to vector<8x32xf32>
    %119 = arith.addf %118, %117 : vector<8x32xf32>
    %120 = arith.divf %118, %119 : vector<8x32xf32>
    %121 = arith.mulf %112, %93 : vector<8x32xf32>
    %122 = arith.mulf %106, %114 : vector<8x32xf32>
    %123 = arith.addf %121, %122 : vector<8x32xf32>
    %124 = math.tanh %123 : vector<8x32xf32>
    %125 = arith.mulf %120, %124 : vector<8x32xf32>
    %c4_i32 = arith.constant 4 : i32
    %126 = arith.index_cast %c4_i32 : i32 to index
    %c0_30 = arith.constant 0 : index
    %c0_31 = arith.constant 0 : index
    %127 = vector.load %arg1[%126, %c0_30, %c0_31] : memref<8x8x128xf32, #tpu.memory_space<vmem>>, vector<1x8x128xf32>
    %128 = vector.shape_cast %127 : vector<1x8x128xf32> to vector<8x128xf32>
    %cst_32 = arith.constant dense<0.000000e+00> : vector<8x128xf32>
    %129 = tpu.matmul %125, %5, %cst_32 {dimension_numbers = #tpu.dot_dimension_numbers<[1], [0], [0], [1], [0, 0, 1, 1], [], []>} : vector<8x32xf32>, vector<32x128xf32>, vector<8x128xf32> -> vector<8x128xf32>
    %130 = arith.addf %128, %129 : vector<8x128xf32>
    %131 = vector.extract_strided_slice %130 {offsets = [0, 0], sizes = [8, 32], strides = [1, 1]} : vector<8x128xf32> to vector<8x32xf32>
    %132 = arith.negf %131 : vector<8x32xf32>
    %133 = math.exp %132 : vector<8x32xf32>
    %cst_33 = arith.constant 1.000000e+00 : f32
    %134 = vector.broadcast %cst_33 : f32 to vector<8x32xf32>
    %135 = arith.addf %134, %133 : vector<8x32xf32>
    %136 = arith.divf %134, %135 : vector<8x32xf32>
    %137 = vector.extract_strided_slice %130 {offsets = [0, 32], sizes = [8, 32], strides = [1, 1]} : vector<8x128xf32> to vector<8x32xf32>
    %138 = arith.negf %137 : vector<8x32xf32>
    %139 = math.exp %138 : vector<8x32xf32>
    %cst_34 = arith.constant 1.000000e+00 : f32
    %140 = vector.broadcast %cst_34 : f32 to vector<8x32xf32>
    %141 = arith.addf %140, %139 : vector<8x32xf32>
    %142 = arith.divf %140, %141 : vector<8x32xf32>
    %143 = vector.extract_strided_slice %130 {offsets = [0, 64], sizes = [8, 32], strides = [1, 1]} : vector<8x128xf32> to vector<8x32xf32>
    %144 = math.tanh %143 : vector<8x32xf32>
    %145 = vector.extract_strided_slice %130 {offsets = [0, 96], sizes = [8, 32], strides = [1, 1]} : vector<8x128xf32> to vector<8x32xf32>
    %146 = arith.negf %145 : vector<8x32xf32>
    %147 = math.exp %146 : vector<8x32xf32>
    %cst_35 = arith.constant 1.000000e+00 : f32
    %148 = vector.broadcast %cst_35 : f32 to vector<8x32xf32>
    %149 = arith.addf %148, %147 : vector<8x32xf32>
    %150 = arith.divf %148, %149 : vector<8x32xf32>
    %151 = arith.mulf %142, %123 : vector<8x32xf32>
    %152 = arith.mulf %136, %144 : vector<8x32xf32>
    %153 = arith.addf %151, %152 : vector<8x32xf32>
    %154 = math.tanh %153 : vector<8x32xf32>
    %155 = arith.mulf %150, %154 : vector<8x32xf32>
    %c5_i32 = arith.constant 5 : i32
    %156 = arith.index_cast %c5_i32 : i32 to index
    %c0_36 = arith.constant 0 : index
    %c0_37 = arith.constant 0 : index
    %157 = vector.load %arg1[%156, %c0_36, %c0_37] : memref<8x8x128xf32, #tpu.memory_space<vmem>>, vector<1x8x128xf32>
    %158 = vector.shape_cast %157 : vector<1x8x128xf32> to vector<8x128xf32>
    %cst_38 = arith.constant dense<0.000000e+00> : vector<8x128xf32>
    %159 = tpu.matmul %155, %5, %cst_38 {dimension_numbers = #tpu.dot_dimension_numbers<[1], [0], [0], [1], [0, 0, 1, 1], [], []>} : vector<8x32xf32>, vector<32x128xf32>, vector<8x128xf32> -> vector<8x128xf32>
    %160 = arith.addf %158, %159 : vector<8x128xf32>
    %161 = vector.extract_strided_slice %160 {offsets = [0, 0], sizes = [8, 32], strides = [1, 1]} : vector<8x128xf32> to vector<8x32xf32>
    %162 = arith.negf %161 : vector<8x32xf32>
    %163 = math.exp %162 : vector<8x32xf32>
    %cst_39 = arith.constant 1.000000e+00 : f32
    %164 = vector.broadcast %cst_39 : f32 to vector<8x32xf32>
    %165 = arith.addf %164, %163 : vector<8x32xf32>
    %166 = arith.divf %164, %165 : vector<8x32xf32>
    %167 = vector.extract_strided_slice %160 {offsets = [0, 32], sizes = [8, 32], strides = [1, 1]} : vector<8x128xf32> to vector<8x32xf32>
    %168 = arith.negf %167 : vector<8x32xf32>
    %169 = math.exp %168 : vector<8x32xf32>
    %cst_40 = arith.constant 1.000000e+00 : f32
    %170 = vector.broadcast %cst_40 : f32 to vector<8x32xf32>
    %171 = arith.addf %170, %169 : vector<8x32xf32>
    %172 = arith.divf %170, %171 : vector<8x32xf32>
    %173 = vector.extract_strided_slice %160 {offsets = [0, 64], sizes = [8, 32], strides = [1, 1]} : vector<8x128xf32> to vector<8x32xf32>
    %174 = math.tanh %173 : vector<8x32xf32>
    %175 = vector.extract_strided_slice %160 {offsets = [0, 96], sizes = [8, 32], strides = [1, 1]} : vector<8x128xf32> to vector<8x32xf32>
    %176 = arith.negf %175 : vector<8x32xf32>
    %177 = math.exp %176 : vector<8x32xf32>
    %cst_41 = arith.constant 1.000000e+00 : f32
    %178 = vector.broadcast %cst_41 : f32 to vector<8x32xf32>
    %179 = arith.addf %178, %177 : vector<8x32xf32>
    %180 = arith.divf %178, %179 : vector<8x32xf32>
    %181 = arith.mulf %172, %153 : vector<8x32xf32>
    %182 = arith.mulf %166, %174 : vector<8x32xf32>
    %183 = arith.addf %181, %182 : vector<8x32xf32>
    %184 = math.tanh %183 : vector<8x32xf32>
    %185 = arith.mulf %180, %184 : vector<8x32xf32>
    %c6_i32 = arith.constant 6 : i32
    %186 = arith.index_cast %c6_i32 : i32 to index
    %c0_42 = arith.constant 0 : index
    %c0_43 = arith.constant 0 : index
    %187 = vector.load %arg1[%186, %c0_42, %c0_43] : memref<8x8x128xf32, #tpu.memory_space<vmem>>, vector<1x8x128xf32>
    %188 = vector.shape_cast %187 : vector<1x8x128xf32> to vector<8x128xf32>
    %cst_44 = arith.constant dense<0.000000e+00> : vector<8x128xf32>
    %189 = tpu.matmul %185, %5, %cst_44 {dimension_numbers = #tpu.dot_dimension_numbers<[1], [0], [0], [1], [0, 0, 1, 1], [], []>} : vector<8x32xf32>, vector<32x128xf32>, vector<8x128xf32> -> vector<8x128xf32>
    %190 = arith.addf %188, %189 : vector<8x128xf32>
    %191 = vector.extract_strided_slice %190 {offsets = [0, 0], sizes = [8, 32], strides = [1, 1]} : vector<8x128xf32> to vector<8x32xf32>
    %192 = arith.negf %191 : vector<8x32xf32>
    %193 = math.exp %192 : vector<8x32xf32>
    %cst_45 = arith.constant 1.000000e+00 : f32
    %194 = vector.broadcast %cst_45 : f32 to vector<8x32xf32>
    %195 = arith.addf %194, %193 : vector<8x32xf32>
    %196 = arith.divf %194, %195 : vector<8x32xf32>
    %197 = vector.extract_strided_slice %190 {offsets = [0, 32], sizes = [8, 32], strides = [1, 1]} : vector<8x128xf32> to vector<8x32xf32>
    %198 = arith.negf %197 : vector<8x32xf32>
    %199 = math.exp %198 : vector<8x32xf32>
    %cst_46 = arith.constant 1.000000e+00 : f32
    %200 = vector.broadcast %cst_46 : f32 to vector<8x32xf32>
    %201 = arith.addf %200, %199 : vector<8x32xf32>
    %202 = arith.divf %200, %201 : vector<8x32xf32>
    %203 = vector.extract_strided_slice %190 {offsets = [0, 64], sizes = [8, 32], strides = [1, 1]} : vector<8x128xf32> to vector<8x32xf32>
    %204 = math.tanh %203 : vector<8x32xf32>
    %205 = vector.extract_strided_slice %190 {offsets = [0, 96], sizes = [8, 32], strides = [1, 1]} : vector<8x128xf32> to vector<8x32xf32>
    %206 = arith.negf %205 : vector<8x32xf32>
    %207 = math.exp %206 : vector<8x32xf32>
    %cst_47 = arith.constant 1.000000e+00 : f32
    %208 = vector.broadcast %cst_47 : f32 to vector<8x32xf32>
    %209 = arith.addf %208, %207 : vector<8x32xf32>
    %210 = arith.divf %208, %209 : vector<8x32xf32>
    %211 = arith.mulf %202, %183 : vector<8x32xf32>
    %212 = arith.mulf %196, %204 : vector<8x32xf32>
    %213 = arith.addf %211, %212 : vector<8x32xf32>
    %214 = math.tanh %213 : vector<8x32xf32>
    %215 = arith.mulf %210, %214 : vector<8x32xf32>
    %c7_i32 = arith.constant 7 : i32
    %216 = arith.index_cast %c7_i32 : i32 to index
    %c0_48 = arith.constant 0 : index
    %c0_49 = arith.constant 0 : index
    %217 = vector.load %arg1[%216, %c0_48, %c0_49] : memref<8x8x128xf32, #tpu.memory_space<vmem>>, vector<1x8x128xf32>
    %218 = vector.shape_cast %217 : vector<1x8x128xf32> to vector<8x128xf32>
    %cst_50 = arith.constant dense<0.000000e+00> : vector<8x128xf32>
    %219 = tpu.matmul %215, %5, %cst_50 {dimension_numbers = #tpu.dot_dimension_numbers<[1], [0], [0], [1], [0, 0, 1, 1], [], []>} : vector<8x32xf32>, vector<32x128xf32>, vector<8x128xf32> -> vector<8x128xf32>
    %220 = arith.addf %218, %219 : vector<8x128xf32>
    %221 = vector.extract_strided_slice %220 {offsets = [0, 0], sizes = [8, 32], strides = [1, 1]} : vector<8x128xf32> to vector<8x32xf32>
    %222 = arith.negf %221 : vector<8x32xf32>
    %223 = math.exp %222 : vector<8x32xf32>
    %cst_51 = arith.constant 1.000000e+00 : f32
    %224 = vector.broadcast %cst_51 : f32 to vector<8x32xf32>
    %225 = arith.addf %224, %223 : vector<8x32xf32>
    %226 = arith.divf %224, %225 : vector<8x32xf32>
    %227 = vector.extract_strided_slice %220 {offsets = [0, 32], sizes = [8, 32], strides = [1, 1]} : vector<8x128xf32> to vector<8x32xf32>
    %228 = arith.negf %227 : vector<8x32xf32>
    %229 = math.exp %228 : vector<8x32xf32>
    %cst_52 = arith.constant 1.000000e+00 : f32
    %230 = vector.broadcast %cst_52 : f32 to vector<8x32xf32>
    %231 = arith.addf %230, %229 : vector<8x32xf32>
    %232 = arith.divf %230, %231 : vector<8x32xf32>
    %233 = vector.extract_strided_slice %220 {offsets = [0, 64], sizes = [8, 32], strides = [1, 1]} : vector<8x128xf32> to vector<8x32xf32>
    %234 = math.tanh %233 : vector<8x32xf32>
    %235 = vector.extract_strided_slice %220 {offsets = [0, 96], sizes = [8, 32], strides = [1, 1]} : vector<8x128xf32> to vector<8x32xf32>
    %236 = arith.negf %235 : vector<8x32xf32>
    %237 = math.exp %236 : vector<8x32xf32>
    %cst_53 = arith.constant 1.000000e+00 : f32
    %238 = vector.broadcast %cst_53 : f32 to vector<8x32xf32>
    %239 = arith.addf %238, %237 : vector<8x32xf32>
    %240 = arith.divf %238, %239 : vector<8x32xf32>
    %241 = arith.mulf %232, %213 : vector<8x32xf32>
    %242 = arith.mulf %226, %234 : vector<8x32xf32>
    %243 = arith.addf %241, %242 : vector<8x32xf32>
    %244 = math.tanh %243 : vector<8x32xf32>
    %245 = arith.mulf %240, %244 : vector<8x32xf32>
    %c8_i32 = arith.constant 8 : i32
    %c0_54 = arith.constant 0 : index
    %c0_55 = arith.constant 0 : index
    %246 = vector.load %arg10[%c0_54, %c0_55] : memref<8x32xf32, #tpu.memory_space<vmem>>, vector<8x32xf32>
    tpu.vector_store %arg10[%c0_54, %c0_55], %245 {strides = array<i32>} : memref<8x32xf32, #tpu.memory_space<vmem>>, vector<8x32xf32>,
    %c0_56 = arith.constant 0 : index
    %c0_57 = arith.constant 0 : index
    %247 = vector.load %arg11[%c0_56, %c0_57] : memref<8x32xf32, #tpu.memory_space<vmem>>, vector<8x32xf32>
    tpu.vector_store %arg11[%c0_56, %c0_57], %243 {strides = array<i32>} : memref<8x32xf32, #tpu.memory_space<vmem>>, vector<8x32xf32>,
    %c0_58 = arith.constant 0 : index
    %c0_59 = arith.constant 0 : index
    %248 = vector.load %arg8[%c0_58, %c0_59] : memref<8x32xf32, #tpu.memory_space<vmem>>, vector<8x32xf32>
    tpu.vector_store %arg8[%c0_58, %c0_59], %245 {strides = array<i32>} : memref<8x32xf32, #tpu.memory_space<vmem>>, vector<8x32xf32>,
    %c0_60 = arith.constant 0 : index
    %c0_61 = arith.constant 0 : index
    %249 = vector.load %arg9[%c0_60, %c0_61] : memref<8x32xf32, #tpu.memory_space<vmem>>, vector<8x32xf32>
    tpu.vector_store %arg9[%c0_60, %c0_61], %243 {strides = array<i32>} : memref<8x32xf32, #tpu.memory_space<vmem>>, vector<8x32xf32>,
    %c0_i32_62 = arith.constant 0 : i32
    %250 = arith.cmpi eq, %arg0, %c0_i32_62 : i32
    %251 = arith.extui %250 : i1 to i32
    %c0_i32_63 = arith.constant 0 : i32
    %252 = arith.cmpi ne, %251, %c0_i32_63 : i32
    scf.if %252 {
      %cst_64 = arith.constant 0.000000e+00 : f32
      %253 = vector.broadcast %cst_64 : f32 to vector<8x32xf32>
      %254 = arith.maximumf %245, %253 : vector<8x32xf32>
      %c0_65 = arith.constant 0 : index
      %c0_66 = arith.constant 0 : index
      %255 = vector.load %arg5[%c0_65, %c0_66] : memref<32x4xf32, #tpu.memory_space<vmem>>, vector<32x4xf32>
      %cst_67 = arith.constant dense<0.000000e+00> : vector<8x4xf32>
      %256 = tpu.matmul %254, %255, %cst_67 {dimension_numbers = #tpu.dot_dimension_numbers<[1], [0], [0], [1], [0, 0, 1, 1], [], []>} : vector<8x32xf32>, vector<32x4xf32>, vector<8x4xf32> -> vector<8x4xf32>
      %c0_68 = arith.constant 0 : index
      %c0_69 = arith.constant 0 : index
      %257 = vector.load %arg6[%c0_68, %c0_69] : memref<1x4xf32, #tpu.memory_space<vmem>>, vector<1x4xf32>
      %258 = vector.broadcast %257 : vector<1x4xf32> to vector<8x4xf32>
      %259 = arith.addf %256, %258 : vector<8x4xf32>
      %c0_70 = arith.constant 0 : index
      %c0_71 = arith.constant 0 : index
      %260 = vector.load %arg7[%c0_70, %c0_71] : memref<8x4xf32, #tpu.memory_space<vmem>>, vector<8x4xf32>
      tpu.vector_store %arg7[%c0_70, %c0_71], %259 {strides = array<i32>} : memref<8x4xf32, #tpu.memory_space<vmem>>, vector<8x4xf32>,
    } else {
    }
    return
  }
  func.func @transform_0(%arg0: i32) -> (i32, i32, i32) {
    %c0_i32 = arith.constant 0 : i32
    %c0_i32_0 = arith.constant 0 : i32
    %c0_i32_1 = arith.constant 0 : i32
    return %arg0, %c0_i32, %c0_i32_0 : i32, i32, i32
  }
  func.func @transform_1(%arg0: i32) -> (i32, i32) {
    %c0_i32 = arith.constant 0 : i32
    %c0_i32_0 = arith.constant 0 : i32
    %c0_i32_1 = arith.constant 0 : i32
    return %c0_i32, %c0_i32_0 : i32, i32
  }
  func.func @transform_2(%arg0: i32) -> (i32, i32) {
    %c0_i32 = arith.constant 0 : i32
    %c0_i32_0 = arith.constant 0 : i32
    %c0_i32_1 = arith.constant 0 : i32
    return %c0_i32, %c0_i32_0 : i32, i32
  }
  func.func @transform_3(%arg0: i32) -> (i32, i32) {
    %c0_i32 = arith.constant 0 : i32
    %c0_i32_0 = arith.constant 0 : i32
    %c0_i32_1 = arith.constant 0 : i32
    return %c0_i32, %c0_i32_0 : i32, i32
  }
  func.func @transform_4(%arg0: i32) -> (i32, i32) {
    %c0_i32 = arith.constant 0 : i32
    %c0_i32_0 = arith.constant 0 : i32
    %c0_i32_1 = arith.constant 0 : i32
    return %c0_i32, %c0_i32_0 : i32, i32
  }
  func.func @transform_5(%arg0: i32) -> (i32, i32) {
    %c0_i32 = arith.constant 0 : i32
    %c0_i32_0 = arith.constant 0 : i32
    %c0_i32_1 = arith.constant 0 : i32
    return %c0_i32, %c0_i32_0 : i32, i32
  }
  func.func @transform_6(%arg0: i32) -> (i32, i32) {
    %c0_i32 = arith.constant 0 : i32
    %c0_i32_0 = arith.constant 0 : i32
    %c0_i32_1 = arith.constant 0 : i32
    return %c0_i32, %c0_i32_0 : i32, i32
  }
  func.func @transform_7(%arg0: i32) -> (i32, i32) {
    %c0_i32 = arith.constant 0 : i32
    %c0_i32_0 = arith.constant 0 : i32
    %c0_i32_1 = arith.constant 0 : i32
    return %c0_i32, %c0_i32_0 : i32, i32
  }
  func.func @transform_8(%arg0: i32) -> (i32, i32) {
    %c0_i32 = arith.constant 0 : i32
    %c0_i32_0 = arith.constant 0 : i32
    %c0_i32_1 = arith.constant 0 : i32
    return %c0_i32, %c0_i32_0 : i32, i32
  }
}

</mosaic_0001>

<bundles_post_ra>
// kernel: lstm_net_forward.4
= control target key start
LH: loop header
LB: loop body
LE: loop exit
PB: predicated region body
PF: predicated region fallthrough
CT: control target
= control target key end

     0   :  { %vm30_vm0 = vcmask 64512   ;;  %s288_s1 = inlined_call_operand.vmem [shape: f32[8,128], index: 1, kind: input, shape index: {}]   ;;  %s289_s0 = inlined_call_operand.vmem [shape: f32[64,8], index: 0, kind: input, shape index: {}]   ;;  %s290_s2 = inlined_call_operand.vmem [shape: f32[1,128], index: 2, kind: input, shape index: {}]   ;;  %s291_s3 = inlined_call_operand.vmem [shape: f32[64,128], index: 3, kind: output, shape index: {}]  }
   0x1   :  { %v22_v0 = vld [vmem:[%s288_s1] sm:$0xff]  ;;  %v15_v3 = vld [vmem:[%s289_s0 + $0x8] sm:$0xff]  ;;  %v16_v5 = vld [vmem:[%s289_s0 + $0x10] sm:$0xff] }
   0x2   :  { %v14_v1 = vld [vmem:[%s289_s0] sm:$0xff]  ;;  %190 = vmatprep.subr.mxu0 %v22_v0  ;;  %204 = vmatprep.subr.mxu1 %v22_v0  ;;  %v19_v4 = vld [vmem:[%s289_s0 + $0x28] sm:$0xff]  ;;  %v20_v6 = vld [vmem:[%s289_s0 + $0x30] sm:$0xff] }
   0x3   :  { %v18_v2 = vld [vmem:[%s289_s0 + $0x20] sm:$0xff]  ;;  %191 = vmatpush3.msra.mxu0 %v22_v0  ;;  %205 = vmatpush3.msra.mxu1 %v22_v0  ;;  %v17_v7 = vld [vmem:[%s289_s0 + $0x18] sm:$0xff] }
   0x4   :  { %192 = vmatprep.mubr.msk.f32.mxu0 %vm30_vm0, %v14_v1  ;;  %198 = vmatprep.mubr.msk.f32.mxu1 %vm30_vm0, %v18_v2  ;;  %v21_v8 = vld [vmem:[%s289_s0 + $0x38] sm:$0xff]  ;;  %v172_v9 = vld [vmem:[%s290_s2] ss:$0 sm:$0xff] }
   0x5   :  { %193 = vmatmul.mubr.msk.f32.vlgmr.msra.gmra.mrb[0].mxu0 %vm30_vm0, %v15_v3  ;;  %199 = vmatmul.mubr.msk.f32.vlgmr.msra.gmra.mrb[0].mxu1 %vm30_vm0, %v19_v4 }
   0x6   :  { %195 = vmatprep.mubr.msk.f32.mxu0 %vm30_vm0, %v16_v5  ;;  %201 = vmatprep.mubr.msk.f32.mxu1 %vm30_vm0, %v20_v6 }
   0x9   :  { %196 = vmatmul.mubr.msk.f32.gmra.mrb[2].mxu0 %vm30_vm0, %v17_v7  ;;  %202 = vmatmul.mubr.msk.f32.gmra.mrb[2].mxu1 %vm30_vm0, %v21_v8 }
  0xd8   :  { %v194_v10 = vpop.f32.mrb[0].mxu0  ;;  %v200_v11 = vpop.f32.mrb[0].mxu1 }
  0xd9   :  { %v127_v12 = vadd.f32 %v194_v10, %v172_v9  ;;  %v147_v13 = vadd.f32 %v200_v11, %v172_v9  ;;  %v121_v14 = vpop.f32.mrb[1].mxu0  ;;  %v141_v15 = vpop.f32.mrb[1].mxu1 }
  0xda   :  { %v122_v16 = vadd.f32 %v172_v9, %v121_v14  ;;  %v142_v17 = vadd.f32 %v172_v9, %v141_v15 }
  0xdb   :  { %161 = vst [vmem:[%s291_s3 + $0x8] sm:$0xff] %v127_v12  ;;  %165 = vst [vmem:[%s291_s3 + $0x28] sm:$0xff] %v147_v13 }
  0xdc   :  { %160 = vst [vmem:[%s291_s3] sm:$0xff] %v122_v16  ;;  %164 = vst [vmem:[%s291_s3 + $0x20] sm:$0xff] %v142_v17  ;;  %v197_v18 = vpop.f32.mrb[2].mxu0  ;;  %v203_v19 = vpop.f32.mrb[2].mxu1 }
  0xdd   :  { %v137_v20 = vadd.f32 %v197_v18, %v172_v9  ;;  %v157_v21 = vadd.f32 %v203_v19, %v172_v9  ;;  %v131_v22 = vpop.f32.mrb[3].mxu0  ;;  %v151_v23 = vpop.f32.mrb[3].mxu1 }
  0xde   :  { %v132_v24 = vadd.f32 %v172_v9, %v131_v22  ;;  %v152_v25 = vadd.f32 %v172_v9, %v151_v23 }
  0xdf   :  { %163 = vst [vmem:[%s291_s3 + $0x18] sm:$0xff] %v137_v20  ;;  %167 = vst [vmem:[%s291_s3 + $0x38] sm:$0xff] %v157_v21 }
  0xe0   :  { %162 = vst [vmem:[%s291_s3 + $0x10] sm:$0xff] %v132_v24  ;;  %166 = vst [vmem:[%s291_s3 + $0x30] sm:$0xff] %v152_v25 }

// kernel: lstm_net_forward.6
= control target key start
LH: loop header
LB: loop body
LE: loop exit
PB: predicated region body
PF: predicated region fallthrough
CT: control target
= control target key end

     0   :  { %vm33_vm0 = vcmask 261120   ;;  %s319_s1 = inlined_call_operand.vmem [shape: f32[32,128], index: 1, kind: input, shape index: {}]   ;;  %s320_s0 = inlined_call_operand.vmem [shape: f32[64,32], index: 0, kind: input, shape index: {}]   ;;  %s321_s2 = inlined_call_operand.vmem [shape: f32[1,128], index: 2, kind: input, shape index: {}]   ;;  %s322_s3 = inlined_call_operand.vmem [shape: f32[64,128], index: 3, kind: output, shape index: {}]  }
   0x1   :  { %v22_v0 = vld [vmem:[%s319_s1] sm:$0xff]  ;;  %v23_v1 = vld [vmem:[%s319_s1 + $0x8] sm:$0xff]  ;;  %v24_v2 = vld [vmem:[%s319_s1 + $0x10] sm:$0xff] }
   0x2   :  { %v216_v3 = vpack.c.bf16 %v23_v1, %v22_v0  ;;  %v25_v4 = vld [vmem:[%s319_s1 + $0x18] sm:$0xff]  ;;  %v14_v5 = vld [vmem:[%s320_s0] sm:$0xff]  ;;  %v15_v8 = vld [vmem:[%s320_s0 + $0x8] sm:$0xff] }
   0x3   :  { %v18_v6 = vld [vmem:[%s320_s0 + $0x20] sm:$0xff]  ;;  %v220_v7 = vpack.c.bf16 %v25_v4, %v24_v2  ;;  %204 = vmatprep.mubr.msk.f32.mxu0 %vm33_vm0, %v14_v5  ;;  %v19_v9 = vld [vmem:[%s320_s0 + $0x28] sm:$0xff]  ;;  %v16_v10 = vld [vmem:[%s320_s0 + $0x10] sm:$0xff] }
   0x4   :  { %210 = vmatprep.mubr.msk.f32.mxu1 %vm33_vm0, %v18_v6  ;;  %217 = vmatprep.subr.bf16.mxu0 %v216_v3  ;;  %v20_v11 = vld [vmem:[%s320_s0 + $0x30] sm:$0xff]  ;;  %v17_v12 = vld [vmem:[%s320_s0 + $0x18] sm:$0xff]  ;;  %v175_v14 = vld [vmem:[%s321_s2] ss:$0 sm:$0xff] }
   0x5   :  { %224 = vmatprep.subr.bf16.mxu1 %v216_v3  ;;  %219 = vmatpush3.bf16.msra.mxu0 %v216_v3  ;;  %v21_v13 = vld [vmem:[%s320_s0 + $0x38] sm:$0xff] }
   0x6   :  { %226 = vmatpush3.bf16.msra.mxu1 %v216_v3  ;;  %221 = vmatprep.subr.bf16.mxu0 %v220_v7 }
   0x7   :  { %225 = vmatprep.subr.bf16.mxu1 %v220_v7 }
   0x9   :  { %223 = vmatpush3.bf16.msra.mxu0 %v220_v7 }
   0xa   :  { %227 = vmatpush3.bf16.msra.mxu1 %v220_v7 }
   0xc   :  { %205 = vmatmul.mubr.msk.f32.vlgmr.msra.gmra.mrb[0].mxu0 %vm33_vm0, %v15_v8 }
   0xd   :  { %211 = vmatmul.mubr.msk.f32.vlgmr.msra.gmra.mrb[0].mxu1 %vm33_vm0, %v19_v9  ;;  %207 = vmatprep.mubr.msk.f32.mxu0 %vm33_vm0, %v16_v10 }
   0xe   :  { %213 = vmatprep.mubr.msk.f32.mxu1 %vm33_vm0, %v20_v11 }
  0x10   :  { %208 = vmatmul.mubr.msk.f32.gmra.mrb[2].mxu0 %vm33_vm0, %v17_v12 }
  0x11   :  { %214 = vmatmul.mubr.msk.f32.gmra.mrb[2].mxu1 %vm33_vm0, %v21_v13 }
  0xdf   :  { %v206_v15 = vpop.f32.mrb[0].mxu0 }
  0xe0   :  { %v212_v16 = vpop.f32.mrb[0].mxu1  ;;  %v130_v17 = vadd.f32 %v206_v15, %v175_v14  ;;  %v124_v19 = vpop.f32.mrb[1].mxu0 }
  0xe1   :  { %v150_v18 = vadd.f32 %v212_v16, %v175_v14  ;;  %v144_v20 = vpop.f32.mrb[1].mxu1  ;;  %v125_v21 = vadd.f32 %v175_v14, %v124_v19 }
  0xe2   :  { %v145_v22 = vadd.f32 %v175_v14, %v144_v20  ;;  %164 = vst [vmem:[%s322_s3 + $0x8] sm:$0xff] %v130_v17 }
  0xe3   :  { %168 = vst [vmem:[%s322_s3 + $0x28] sm:$0xff] %v150_v18  ;;  %163 = vst [vmem:[%s322_s3] sm:$0xff] %v125_v21  ;;  %v209_v23 = vpop.f32.mrb[2].mxu0 }
  0xe4   :  { %167 = vst [vmem:[%s322_s3 + $0x20] sm:$0xff] %v145_v22  ;;  %v215_v24 = vpop.f32.mrb[2].mxu1  ;;  %v140_v25 = vadd.f32 %v209_v23, %v175_v14  ;;  %v134_v27 = vpop.f32.mrb[3].mxu0 }
  0xe5   :  { %v160_v26 = vadd.f32 %v215_v24, %v175_v14  ;;  %v154_v28 = vpop.f32.mrb[3].mxu1  ;;  %v135_v29 = vadd.f32 %v175_v14, %v134_v27 }
  0xe6   :  { %v155_v30 = vadd.f32 %v175_v14, %v154_v28  ;;  %166 = vst [vmem:[%s322_s3 + $0x18] sm:$0xff] %v140_v25 }
  0xe7   :  { %170 = vst [vmem:[%s322_s3 + $0x38] sm:$0xff] %v160_v26  ;;  %165 = vst [vmem:[%s322_s3 + $0x10] sm:$0xff] %v135_v29 }
  0xe8   :  { %169 = vst [vmem:[%s322_s3 + $0x30] sm:$0xff] %v155_v30 }

// kernel: lstm_net_forward.5
= control target key start
LH: loop header
LB: loop body
LE: loop exit
PB: predicated region body
PF: predicated region fallthrough
CT: control target
= control target key end

     0   :  { %vm25_vm0 = vcmask 261120   ;;  %v1175_v0 = vmov 0.0|0.0   ;;  %vm1176_vm1 = vmmov 0   ;;  %v1177_v4 = vmov 0.0   ;;  %s1178_s9 = smov 64   ;;  %s1179_s10 = smov 32   ;;  %s1395_s3 = inlined_call_operand.vmem [shape: f32[32,128], index: 3, kind: input, shape index: {}]   ;;  %s1396_s1 = inlined_call_operand.vmem [shape: f32[8,32], index: 1, kind: input, shape index: {}]   ;;  %s1397_s2 = inlined_call_operand.vmem [shape: f32[8,32], index: 2, kind: input, shape index: {}]   ;;  %s1398_s0 = inlined_call_operand.vmem [shape: f32[8,8,128], index: 0, kind: input, shape index: {}]   ;;  %s1399_s4 = inlined_call_operand.vmem [shape: f32[8,8,32], index: 4, kind: output, shape index: {0}]   ;;  %s1400_s6 = inlined_call_operand.vmem [shape: f32[8,32], index: 6, kind: output, shape index: {2}]   ;;  %s1401_s5 = inlined_call_operand.vmem [shape: f32[8,32], index: 5, kind: output, shape index: {1}]  }
   0x1   :  { %1057 = vmatprep.subr.bf16.mxu0 %v1175_v0  ;;  %v31_v1 = vld [vmem:[%s1395_s3] sm:$0xff]  ;;  %v32_v2 = vld [vmem:[%s1395_s3 + $0x8] sm:$0xff]  ;;  %v33_v3 = vld [vmem:[%s1395_s3 + $0x10] sm:$0xff]  ;;  %977 = vmatprep.mubr.msk.f32.mxu0 %vm1176_vm1, %v1177_v4 }
   0x2   :  { %v1228_v5 = vpack.c.bf16 %v32_v2, %v31_v1  ;;  %v34_v6 = vld [vmem:[%s1395_s3 + $0x18] sm:$0xff]  ;;  %v24_v7 = vld [vmem:[%s1396_s1] sm:$0xff]  ;;  %1063 = vmatprep.subr.bf16.mxu1 %v1175_v0  ;;  %988 = vmatprep.mubr.msk.f32.mxu1 %vm1176_vm1, %v1177_v4  ;;  %v901_v31 = vld [vmem:[%s1398_s0 + $0x8] sm:$0xff] }
   0x3   :  { %26 = vst.msk [vmem:[#allocation2] sm:$0xff] %vm25_vm0, %v24_v7  ;;  %v1241_v8 = vpack.c.bf16 %v34_v6, %v33_v3  ;;  %v27_v10 = vld [vmem:[%s1397_s2] sm:$0xff]  ;;  %v905_v49 = vld [vmem:[%s1398_s0 + $0x10] sm:$0xff]  ;;  %v909_v6 = vld [vmem:[%s1398_s0 + $0x18] sm:$0xff] }
   0x4   :  { %1059 = vmatpush3.bf16.msra.mxu0 %v1228_v5  ;;  %1065 = vmatpush3.bf16.msra.mxu1 %v1228_v5  ;;  %28 = vst.msk [vmem:[#allocation3] sm:$0xff] %vm25_vm0, %v27_v10  ;;  %v35_v11 = vld [vmem:[%s1398_s0] sm:$0xff] }
   0x5   :  { %1060 = vmatprep.subr.bf16.mxu0 %v1175_v0  ;;  %1066 = vmatprep.subr.bf16.mxu1 %v1175_v0 }
   0x8   :  { %1062 = vmatpush3.bf16.msra.mxu0 %v1241_v8  ;;  %1068 = vmatpush3.bf16.msra.mxu1 %v1241_v8 }
   0x9   :  { %1069 = vmatprep.subr.bf16.mxu0 %v1175_v0  ;;  %1075 = vmatprep.subr.bf16.mxu1 %v1175_v0 }
   0xa   :  { %v29_v9 = vld [vmem:[#allocation2] sm:$0xff] }
   0xb   :  { %978 = vmatmul.mubr.msk.f32.vlgmr.msra.gmra.mrb[0].mxu0 %vm25_vm0, %v29_v9  ;;  %v30_v16 = vld [vmem:[#allocation3] sm:$0xff] }
   0xc   :  { %1071 = vmatpush3.bf16.msra.mxu0 %v1228_v5  ;;  %999 = vmatprep.mubr.msk.f32.mxu0 %vm1176_vm1, %v1177_v4 }
   0xd   :  { %1072 = vmatprep.subr.bf16.mxu0 %v1175_v0 }
  0x10   :  { %1074 = vmatpush3.bf16.msra.mxu0 %v1241_v8 }
  0x11   :  { %1081 = vmatprep.subr.bf16.mxu0 %v1175_v0 }
  0xde   :  { %v106_v12 = vpop.f32.mrb[0].mxu0 }
  0xdf   :  { %v110_v13 = vadd.f32 %v106_v12, %v35_v11  ;;  %v979_v14 = vpop.f32.mrb[1].mxu0 }
  0xe1   :  { %1111 = vtanh.f32 %v110_v13  ;;  %v900_v17 = vmul.f32 -1.442695, %v110_v13 }
  0xe3   :  { %1113 = vpow2.f32 %v900_v17 }
  0xeb   :  { %v1112_v15 = vpop.eup %1111 }
  0xec   :  { %124 = vrot.lane.b32.xlu0 %v1112_v15, %s1178_s9 }
  0xed   :  { %v1114_v18 = vpop.eup %1113 }
  0xee   :  { %v114_v19 = vadd.f32 1.0, %v1114_v18 }
  0xf0   :  { %119 = vrot.lane.b32.xlu0 %v30_v16, %s1179_s10  ;;  %1115 = vrcp.f32 %v114_v19 }
  0xfa   :  { %v1116_v20 = vpop.eup %1115 }
 0x15e   :  { %v125_v21 = vpop.permute.xlu0 %124 }
 0x15f   :  { %v127_v22 = vmul.f32 %v1116_v20, %v125_v21 }
 0x161   :  { %129 = vrot.lane.b32.xlu1 %v127_v22, %s1179_s10 }
 0x162   :  { %v120_v23 = vpop.permute.xlu0 %119 }
 0x163   :  { %v122_v24 = vmul.f32 %v1116_v20, %v120_v23 }
 0x1d3   :  { %v130_v25 = vpop.permute.xlu1 %129 }
 0x1d4   :  { %v132_v26 = vadd.f32 %v130_v25, %v122_v24  ;;  %v913_v25 = vld [vmem:[%s1398_s0 + $0x20] sm:$0xff] }
 0x1d6   :  { %1117 = vtanh.f32 %v132_v26 }
 0x1e0   :  { %v1118_v27 = vpop.eup %1117 }
 0x1e1   :  { %135 = vrot.lane.b32.xlu1 %v1118_v27, %s1178_s9 }
 0x253   :  { %v136_v28 = vpop.permute.xlu1 %135 }
 0x254   :  { %v138_v29 = vmul.f32 %v1116_v20, %v136_v28 }
 0x256   :  { %140 = vrot.lane.b32.xlu0 %v138_v29, %s1179_s10 }
 0x2c8   :  { %v141_v30 = vpop.permute.xlu0 %140 }
 0x2c9   :  { %143 = vst.msk [vmem:[%s1399_s4] sm:$0xff] %vm25_vm0, %v141_v30  ;;  %989 = vmatmul.mubr.msk.f32.vlgmr.msra.gmra.mrb[0].mxu1 %vm25_vm0, %v141_v30 }
 0x2ca   :  { %1077 = vmatpush3.bf16.msra.mxu1 %v1228_v5  ;;  %1010 = vmatprep.mubr.msk.f32.mxu1 %vm1176_vm1, %v1177_v4 }
 0x2cb   :  { %1078 = vmatprep.subr.bf16.mxu1 %v1175_v0 }
 0x2ce   :  { %1080 = vmatpush3.bf16.msra.mxu1 %v1241_v8 }
 0x2cf   :  { %1087 = vmatprep.subr.bf16.mxu1 %v1175_v0 }
 0x39c   :  { %v214_v32 = vpop.f32.mrb[0].mxu1 }
 0x39d   :  { %v218_v33 = vadd.f32 %v901_v31, %v214_v32  ;;  %v990_v34 = vpop.f32.mrb[1].mxu1 }
 0x39f   :  { %1119 = vtanh.f32 %v218_v33  ;;  %v903_v36 = vmul.f32 -1.442695, %v218_v33 }
 0x3a1   :  { %1121 = vpow2.f32 %v903_v36 }
 0x3a9   :  { %v1120_v35 = vpop.eup %1119 }
 0x3aa   :  { %228 = vrot.lane.b32.xlu1 %v1120_v35, %s1178_s9 }
 0x3ab   :  { %v1122_v37 = vpop.eup %1121 }
 0x3ac   :  { %v222_v38 = vadd.f32 1.0, %v1122_v37 }
 0x3ae   :  { %1123 = vrcp.f32 %v222_v38 }
 0x3b8   :  { %v1124_v39 = vpop.eup %1123 }
 0x3b9   :  { %v226_v42 = vmul.f32 %v1124_v39, %v132_v26 }
 0x41c   :  { %v229_v40 = vpop.permute.xlu1 %228 }
 0x41d   :  { %v231_v41 = vmul.f32 %v1124_v39, %v229_v40 }
 0x41f   :  { %233 = vrot.lane.b32.xlu0 %v231_v41, %s1179_s10 }
 0x491   :  { %v234_v43 = vpop.permute.xlu0 %233 }
 0x492   :  { %v236_v44 = vadd.f32 %v234_v43, %v226_v42  ;;  %v917_v43 = vld [vmem:[%s1398_s0 + $0x28] sm:$0xff] }
 0x494   :  { %1125 = vtanh.f32 %v236_v44 }
 0x49e   :  { %v1126_v45 = vpop.eup %1125 }
 0x49f   :  { %239 = vrot.lane.b32.xlu1 %v1126_v45, %s1178_s9 }
 0x511   :  { %v240_v46 = vpop.permute.xlu1 %239 }
 0x512   :  { %v242_v47 = vmul.f32 %v1124_v39, %v240_v46 }
 0x514   :  { %244 = vrot.lane.b32.xlu0 %v242_v47, %s1179_s10 }
 0x586   :  { %v245_v48 = vpop.permute.xlu0 %244 }
 0x587   :  { %904 = vst.msk [vmem:[%s1399_s4 + $0x8] sm:$0xff] %vm25_vm0, %v245_v48  ;;  %1000 = vmatmul.mubr.msk.f32.vlgmr.msra.gmra.mrb[2].mxu0 %vm25_vm0, %v245_v48 }
 0x588   :  { %1083 = vmatpush3.bf16.msra.mxu0 %v1228_v5  ;;  %1021 = vmatprep.mubr.msk.f32.mxu0 %vm1176_vm1, %v1177_v4 }
 0x589   :  { %1084 = vmatprep.subr.bf16.mxu0 %v1175_v0 }
 0x58c   :  { %1086 = vmatpush3.bf16.msra.mxu0 %v1241_v8 }
 0x58d   :  { %1093 = vmatprep.subr.bf16.mxu0 %v1175_v0 }
 0x65a   :  { %v319_v50 = vpop.f32.mrb[2].mxu0 }
 0x65b   :  { %v323_v51 = vadd.f32 %v905_v49, %v319_v50  ;;  %v1001_v52 = vpop.f32.mrb[3].mxu0 }
 0x65d   :  { %1127 = vtanh.f32 %v323_v51  ;;  %v907_v54 = vmul.f32 -1.442695, %v323_v51 }
 0x65f   :  { %1129 = vpow2.f32 %v907_v54 }
 0x667   :  { %v1128_v53 = vpop.eup %1127 }
 0x668   :  { %333 = vrot.lane.b32.xlu1 %v1128_v53, %s1178_s9 }
 0x669   :  { %v1130_v55 = vpop.eup %1129 }
 0x66a   :  { %v327_v56 = vadd.f32 1.0, %v1130_v55 }
 0x66c   :  { %1131 = vrcp.f32 %v327_v56 }
 0x676   :  { %v1132_v57 = vpop.eup %1131 }
 0x677   :  { %v331_v60 = vmul.f32 %v1132_v57, %v236_v44 }
 0x6da   :  { %v334_v58 = vpop.permute.xlu1 %333 }
 0x6db   :  { %v336_v59 = vmul.f32 %v1132_v57, %v334_v58 }
 0x6dd   :  { %338 = vrot.lane.b32.xlu0 %v336_v59, %s1179_s10 }
 0x74f   :  { %v339_v61 = vpop.permute.xlu0 %338 }
 0x750   :  { %v341_v62 = vadd.f32 %v339_v61, %v331_v60 }
 0x752   :  { %1133 = vtanh.f32 %v341_v62 }
 0x75c   :  { %v1134_v63 = vpop.eup %1133 }
 0x75d   :  { %344 = vrot.lane.b32.xlu1 %v1134_v63, %s1178_s9 }
 0x7cf   :  { %v345_v1 = vpop.permute.xlu1 %344 }
 0x7d0   :  { %v347_v2 = vmul.f32 %v1132_v57, %v345_v1  ;;  %v921_v57 = vld [vmem:[%s1398_s0 + $0x30] sm:$0xff] }
 0x7d2   :  { %349 = vrot.lane.b32.xlu0 %v347_v2, %s1179_s10 }
 0x844   :  { %v350_v3 = vpop.permute.xlu0 %349 }
 0x845   :  { %908 = vst.msk [vmem:[%s1399_s4 + $0x10] sm:$0xff] %vm25_vm0, %v350_v3  ;;  %1011 = vmatmul.mubr.msk.f32.vlgmr.msra.gmra.mrb[2].mxu1 %vm25_vm0, %v350_v3 }
 0x846   :  { %1089 = vmatpush3.bf16.msra.mxu1 %v1228_v5  ;;  %1032 = vmatprep.mubr.msk.f32.mxu1 %vm1176_vm1, %v1177_v4 }
 0x847   :  { %1090 = vmatprep.subr.bf16.mxu1 %v1175_v0 }
 0x84a   :  { %1092 = vmatpush3.bf16.msra.mxu1 %v1241_v8 }
 0x84b   :  { %1099 = vmatprep.subr.bf16.mxu1 %v1175_v0 }
 0x918   :  { %v424_v7 = vpop.f32.mrb[2].mxu1 }
 0x919   :  { %v428_v9 = vadd.f32 %v909_v6, %v424_v7  ;;  %v1012_v10 = vpop.f32.mrb[3].mxu1 }
 0x91b   :  { %1135 = vtanh.f32 %v428_v9  ;;  %v911_v12 = vmul.f32 -1.442695, %v428_v9 }
 0x91d   :  { %1137 = vpow2.f32 %v911_v12 }
 0x925   :  { %v1136_v11 = vpop.eup %1135 }
 0x926   :  { %438 = vrot.lane.b32.xlu1 %v1136_v11, %s1178_s9 }
 0x927   :  { %v1138_v13 = vpop.eup %1137 }
 0x928   :  { %v432_v14 = vadd.f32 1.0, %v1138_v13 }
 0x92a   :  { %1139 = vrcp.f32 %v432_v14 }
 0x934   :  { %v1140_v15 = vpop.eup %1139 }
 0x935   :  { %v436_v18 = vmul.f32 %v1140_v15, %v341_v62 }
 0x998   :  { %v439_v16 = vpop.permute.xlu1 %438 }
 0x999   :  { %v441_v17 = vmul.f32 %v1140_v15, %v439_v16 }
 0x99b   :  { %443 = vrot.lane.b32.xlu0 %v441_v17, %s1179_s10 }
 0xa0d   :  { %v444_v19 = vpop.permute.xlu0 %443 }
 0xa0e   :  { %v446_v20 = vadd.f32 %v444_v19, %v436_v18 }
 0xa10   :  { %1141 = vtanh.f32 %v446_v20 }
 0xa1a   :  { %v1142_v21 = vpop.eup %1141 }
 0xa1b   :  { %449 = vrot.lane.b32.xlu1 %v1142_v21, %s1178_s9 }
 0xa8d   :  { %v450_v22 = vpop.permute.xlu1 %449 }
 0xa8e   :  { %v452_v23 = vmul.f32 %v1140_v15, %v450_v22  ;;  %v925_v15 = vld [vmem:[%s1398_s0 + $0x38] sm:$0xff]  ;;  %s1180_s0 = smov 96  }
 0xa90   :  { %454 = vrot.lane.b32.xlu0 %v452_v23, %s1179_s10 }
 0xb02   :  { %v455_v24 = vpop.permute.xlu0 %454 }
 0xb03   :  { %912 = vst.msk [vmem:[%s1399_s4 + $0x18] sm:$0xff] %vm25_vm0, %v455_v24  ;;  %1022 = vmatmul.mubr.msk.f32.vlgmr.msra.gmra.mrb[4].mxu0 %vm25_vm0, %v455_v24 }
 0xb04   :  { %1095 = vmatpush3.bf16.msra.mxu0 %v1228_v5  ;;  %1043 = vmatprep.mubr.msk.f32.mxu0 %vm1176_vm1, %v1177_v4 }
 0xb05   :  { %1096 = vmatprep.subr.bf16.mxu0 %v1175_v0 }
 0xb08   :  { %1098 = vmatpush3.bf16.msra.mxu0 %v1241_v8 }
 0xbd6   :  { %v529_v26 = vpop.f32.mrb[4].mxu0 }
 0xbd7   :  { %v533_v27 = vadd.f32 %v913_v25, %v529_v26  ;;  %v1023_v28 = vpop.f32.mrb[5].mxu0 }
 0xbd9   :  { %1143 = vtanh.f32 %v533_v27  ;;  %v915_v30 = vmul.f32 -1.442695, %v533_v27 }
 0xbdb   :  { %1145 = vpow2.f32 %v915_v30 }
 0xbe3   :  { %v1144_v29 = vpop.eup %1143 }
 0xbe4   :  { %543 = vrot.lane.b32.xlu1 %v1144_v29, %s1178_s9 }
 0xbe5   :  { %v1146_v31 = vpop.eup %1145 }
 0xbe6   :  { %v537_v32 = vadd.f32 1.0, %v1146_v31 }
 0xbe8   :  { %1147 = vrcp.f32 %v537_v32 }
 0xbf2   :  { %v1148_v33 = vpop.eup %1147 }
 0xbf3   :  { %v541_v36 = vmul.f32 %v1148_v33, %v446_v20 }
 0xc56   :  { %v544_v34 = vpop.permute.xlu1 %543 }
 0xc57   :  { %v546_v35 = vmul.f32 %v1148_v33, %v544_v34 }
 0xc59   :  { %548 = vrot.lane.b32.xlu0 %v546_v35, %s1179_s10 }
 0xccb   :  { %v549_v37 = vpop.permute.xlu0 %548 }
 0xccc   :  { %v551_v38 = vadd.f32 %v549_v37, %v541_v36 }
 0xcce   :  { %1149 = vtanh.f32 %v551_v38 }
 0xcd8   :  { %v1150_v39 = vpop.eup %1149 }
 0xcd9   :  { %554 = vrot.lane.b32.xlu1 %v1150_v39, %s1178_s9 }
 0xd4b   :  { %v555_v40 = vpop.permute.xlu1 %554 }
 0xd4c   :  { %v557_v41 = vmul.f32 %v1148_v33, %v555_v40 }
 0xd4e   :  { %559 = vrot.lane.b32.xlu0 %v557_v41, %s1179_s10 }
 0xdc0   :  { %v560_v42 = vpop.permute.xlu0 %559 }
 0xdc1   :  { %916 = vst.msk [vmem:[%s1399_s4 + $0x20] sm:$0xff] %vm25_vm0, %v560_v42  ;;  %1033 = vmatmul.mubr.msk.f32.vlgmr.msra.gmra.mrb[4].mxu1 %vm25_vm0, %v560_v42 }
 0xdc2   :  { %1101 = vmatpush3.bf16.msra.mxu1 %v1228_v5  ;;  %1054 = vmatprep.mubr.msk.f32.mxu1 %vm1176_vm1, %v1177_v4 }
 0xdc3   :  { %1102 = vmatprep.subr.bf16.mxu1 %v1175_v0 }
 0xdc6   :  { %1104 = vmatpush3.bf16.msra.mxu1 %v1241_v8 }
 0xe94   :  { %v634_v44 = vpop.f32.mrb[4].mxu1 }
 0xe95   :  { %v638_v45 = vadd.f32 %v917_v43, %v634_v44  ;;  %v1034_v46 = vpop.f32.mrb[5].mxu1 }
 0xe97   :  { %1151 = vtanh.f32 %v638_v45  ;;  %v919_v48 = vmul.f32 -1.442695, %v638_v45 }
 0xe99   :  { %1153 = vpow2.f32 %v919_v48 }
 0xea1   :  { %v1152_v47 = vpop.eup %1151 }
 0xea2   :  { %648 = vrot.lane.b32.xlu1 %v1152_v47, %s1178_s9 }
 0xea3   :  { %v1154_v5 = vpop.eup %1153 }
 0xea4   :  { %v642_v49 = vadd.f32 1.0, %v1154_v5 }
 0xea6   :  { %1155 = vrcp.f32 %v642_v49 }
 0xeb0   :  { %v1156_v4 = vpop.eup %1155 }
 0xeb1   :  { %v646_v8 = vmul.f32 %v1156_v4, %v551_v38 }
 0xf14   :  { %v649_v0 = vpop.permute.xlu1 %648 }
 0xf15   :  { %v651_v50 = vmul.f32 %v1156_v4, %v649_v0 }
 0xf17   :  { %653 = vrot.lane.b32.xlu0 %v651_v50, %s1179_s10 }
 0xf89   :  { %v654_v51 = vpop.permute.xlu0 %653 }
 0xf8a   :  { %v656_v52 = vadd.f32 %v654_v51, %v646_v8 }
 0xf8c   :  { %1157 = vtanh.f32 %v656_v52 }
 0xf96   :  { %v1158_v53 = vpop.eup %1157 }
 0xf97   :  { %659 = vrot.lane.b32.xlu1 %v1158_v53, %s1178_s9 }
0x1009   :  { %v660_v54 = vpop.permute.xlu1 %659 }
0x100a   :  { %v662_v55 = vmul.f32 %v1156_v4, %v660_v54 }
0x100c   :  { %664 = vrot.lane.b32.xlu0 %v662_v55, %s1179_s10 }
0x107e   :  { %v665_v56 = vpop.permute.xlu0 %664 }
0x107f   :  { %920 = vst.msk [vmem:[%s1399_s4 + $0x28] sm:$0xff] %vm25_vm0, %v665_v56  ;;  %1044 = vmatmul.mubr.msk.f32.vlgmr.msra.gmra.mrb[6].mxu0 %vm25_vm0, %v665_v56 }
0x1152   :  { %v739_v58 = vpop.f32.mrb[6].mxu0 }
0x1153   :  { %v743_v59 = vadd.f32 %v921_v57, %v739_v58  ;;  %v1045_v60 = vpop.f32.mrb[7].mxu0 }
0x1155   :  { %1159 = vtanh.f32 %v743_v59  ;;  %v923_v62 = vmul.f32 -1.442695, %v743_v59 }
0x1157   :  { %1161 = vpow2.f32 %v923_v62 }
0x115f   :  { %v1160_v61 = vpop.eup %1159 }
0x1160   :  { %753 = vrot.lane.b32.xlu1 %v1160_v61, %s1178_s9 }
0x1161   :  { %v1162_v63 = vpop.eup %1161 }
0x1162   :  { %v747_v1 = vadd.f32 1.0, %v1162_v63 }
0x1164   :  { %1163 = vrcp.f32 %v747_v1 }
0x116e   :  { %v1164_v2 = vpop.eup %1163 }
0x116f   :  { %v751_v7 = vmul.f32 %v1164_v2, %v656_v52 }
0x11d2   :  { %v754_v3 = vpop.permute.xlu1 %753 }
0x11d3   :  { %v756_v6 = vmul.f32 %v1164_v2, %v754_v3 }
0x11d5   :  { %758 = vrot.lane.b32.xlu0 %v756_v6, %s1179_s10 }
0x1247   :  { %v759_v9 = vpop.permute.xlu0 %758 }
0x1248   :  { %v761_v10 = vadd.f32 %v759_v9, %v751_v7 }
0x124a   :  { %1165 = vtanh.f32 %v761_v10 }
0x1254   :  { %v1166_v11 = vpop.eup %1165 }
0x1255   :  { %764 = vrot.lane.b32.xlu1 %v1166_v11, %s1178_s9 }
0x12c7   :  { %v765_v12 = vpop.permute.xlu1 %764 }
0x12c8   :  { %v767_v13 = vmul.f32 %v1164_v2, %v765_v12 }
0x12ca   :  { %769 = vrot.lane.b32.xlu0 %v767_v13, %s1179_s10 }
0x133c   :  { %v770_v14 = vpop.permute.xlu0 %769 }
0x133d   :  { %924 = vst.msk [vmem:[%s1399_s4 + $0x30] sm:$0xff] %vm25_vm0, %v770_v14  ;;  %1055 = vmatmul.mubr.msk.f32.vlgmr.msra.gmra.mrb[6].mxu1 %vm25_vm0, %v770_v14 }
0x1410   :  { %v844_v16 = vpop.f32.mrb[6].mxu1 }
0x1411   :  { %v848_v17 = vadd.f32 %v925_v15, %v844_v16  ;;  %v1056_v18 = vpop.f32.mrb[7].mxu1 }
0x1413   :  { %1167 = vtanh.f32 %v848_v17  ;;  %v927_v20 = vmul.f32 -1.442695, %v848_v17 }
0x1415   :  { %1169 = vpow2.f32 %v927_v20 }
0x141d   :  { %v1168_v19 = vpop.eup %1167 }
0x141e   :  { %858 = vrot.lane.b32.xlu1 %v1168_v19, %s1178_s9 }
0x141f   :  { %v1170_v21 = vpop.eup %1169 }
0x1420   :  { %v852_v22 = vadd.f32 1.0, %v1170_v21 }
0x1422   :  { %1171 = vrcp.f32 %v852_v22 }
0x142c   :  { %v1172_v23 = vpop.eup %1171 }
0x142d   :  { %v856_v26 = vmul.f32 %v1172_v23, %v761_v10 }
0x1490   :  { %v859_v24 = vpop.permute.xlu1 %858 }
0x1491   :  { %v861_v25 = vmul.f32 %v1172_v23, %v859_v24 }
0x1493   :  { %863 = vrot.lane.b32.xlu0 %v861_v25, %s1179_s10 }
0x1505   :  { %v864_v27 = vpop.permute.xlu0 %863 }
0x1506   :  { %v866_v28 = vadd.f32 %v864_v27, %v856_v26 }
0x1508   :  { %1173 = vtanh.f32 %v866_v28 }
0x1512   :  { %v1174_v29 = vpop.eup %1173 }
0x1513   :  { %869 = vrot.lane.b32.xlu1 %v1174_v29, %s1178_s9 }
0x1517   :  { %881 = vrot.lane.b32.xlu1 %v866_v28, %s1180_s0 }
0x1585   :  { %v870_v30 = vpop.permute.xlu1 %869 }
0x1586   :  { %v872_v31 = vmul.f32 %v1172_v23, %v870_v30 }
0x1588   :  { %874 = vrot.lane.b32.xlu0 %v872_v31, %s1179_s10 }
0x1589   :  { %v882_v32 = vpop.permute.xlu1 %881 }
0x158a   :  { %884 = vst.msk [vmem:[#allocation3] sm:$0xff] %vm25_vm0, %v882_v32  ;;  %886 = vst.msk [vmem:[%s1400_s6] sm:$0xff] %vm25_vm0, %v882_v32 }
0x15fa   :  { %v875_v33 = vpop.permute.xlu0 %874 }
0x15fb   :  { %928 = vst.msk [vmem:[%s1399_s4 + $0x38] sm:$0xff] %vm25_vm0, %v875_v33  ;;  %879 = vst.msk [vmem:[#allocation2] sm:$0xff] %vm25_vm0, %v875_v33 }
0x15fc   :  { %885 = vst.msk [vmem:[%s1401_s5] sm:$0xff] %vm25_vm0, %v875_v33 }

// kernel: lstm_net_forward.7
= control target key start
LH: loop header
LB: loop body
LE: loop exit
PB: predicated region body
PF: predicated region fallthrough
CT: control target
= control target key end

     0   :  { %vm31_vm0 = vcmask 261120   ;;  %v1268_v0 = vmov 0.0|0.0   ;;  %vm1269_vm1 = vmmov 0   ;;  %v1270_v4 = vmov 0.0   ;;  %s1271_s17 = smov 64   ;;  %s1272_s18 = smov 32   ;;  %s1490_s3 = inlined_call_operand.vmem [shape: f32[32,128], index: 3, kind: input, shape index: {}]   ;;  %s1491_s1 = inlined_call_operand.vmem [shape: f32[8,32], index: 1, kind: input, shape index: {}]   ;;  %s1492_s2 = inlined_call_operand.vmem [shape: f32[8,32], index: 2, kind: input, shape index: {}]   ;;  %s1493_s0 = inlined_call_operand.vmem [shape: f32[8,8,128], index: 0, kind: input, shape index: {}]   ;;  %s1494_s4 = inlined_call_operand.vmem [shape: f32[32,4], index: 4, kind: input, shape index: {}]   ;;  %s1495_s7 = inlined_call_operand.vmem [shape: f32[8,32], index: 7, kind: output, shape index: {1}]   ;;  %s1496_s8 = inlined_call_operand.vmem [shape: f32[8,32], index: 8, kind: output, shape index: {2}]   ;;  %s1497_s5 = inlined_call_operand.vmem [shape: f32[1,4], index: 5, kind: input, shape index: {}]   ;;  %s1498_s6 = inlined_call_operand.vmem [shape: f32[8,4], index: 6, kind: output, shape index: {0}]  }
   0x1   :  { %1144 = vmatprep.subr.bf16.mxu0 %v1268_v0  ;;  %v37_v1 = vld [vmem:[%s1490_s3] sm:$0xff]  ;;  %v38_v2 = vld [vmem:[%s1490_s3 + $0x8] sm:$0xff]  ;;  %v39_v3 = vld [vmem:[%s1490_s3 + $0x10] sm:$0xff]  ;;  %1053 = vmatprep.mubr.msk.f32.mxu0 %vm1269_vm1, %v1270_v4  ;;  %s1273_s15 = smov 96   ;;  %vm961_vm2 = vcmask 31744  }
   0x2   :  { %v1331_v5 = vpack.c.bf16 %v38_v2, %v37_v1  ;;  %v40_v6 = vld [vmem:[%s1490_s3 + $0x18] sm:$0xff]  ;;  %v30_v7 = vld [vmem:[%s1491_s1] sm:$0xff]  ;;  %1150 = vmatprep.subr.bf16.mxu1 %v1268_v0  ;;  %1064 = vmatprep.mubr.msk.f32.mxu1 %vm1269_vm1, %v1270_v4  ;;  %v977_v31 = vld [vmem:[%s1493_s0 + $0x8] sm:$0xff] }
   0x3   :  { %32 = vst.msk [vmem:[#allocation2] sm:$0xff] %vm31_vm0, %v30_v7  ;;  %v1344_v8 = vpack.c.bf16 %v40_v6, %v39_v3  ;;  %v33_v10 = vld [vmem:[%s1492_s2] sm:$0xff]  ;;  %v980_v49 = vld [vmem:[%s1493_s0 + $0x10] sm:$0xff]  ;;  %v983_v6 = vld [vmem:[%s1493_s0 + $0x18] sm:$0xff] }
   0x4   :  { %1146 = vmatpush3.bf16.msra.mxu0 %v1331_v5  ;;  %1152 = vmatpush3.bf16.msra.mxu1 %v1331_v5  ;;  %34 = vst.msk [vmem:[#allocation3] sm:$0xff] %vm31_vm0, %v33_v10  ;;  %v41_v11 = vld [vmem:[%s1493_s0] sm:$0xff] }
   0x5   :  { %1147 = vmatprep.subr.bf16.mxu0 %v1268_v0  ;;  %1153 = vmatprep.subr.bf16.mxu1 %v1268_v0 }
   0x8   :  { %1149 = vmatpush3.bf16.msra.mxu0 %v1344_v8  ;;  %1155 = vmatpush3.bf16.msra.mxu1 %v1344_v8 }
   0x9   :  { %1156 = vmatprep.subr.bf16.mxu0 %v1268_v0  ;;  %1162 = vmatprep.subr.bf16.mxu1 %v1268_v0 }
   0xa   :  { %v35_v9 = vld [vmem:[#allocation2] sm:$0xff] }
   0xb   :  { %1054 = vmatmul.mubr.msk.f32.vlgmr.msra.gmra.mrb[0].mxu0 %vm31_vm0, %v35_v9  ;;  %v36_v16 = vld [vmem:[#allocation3] sm:$0xff] }
   0xc   :  { %1158 = vmatpush3.bf16.msra.mxu0 %v1331_v5  ;;  %1075 = vmatprep.mubr.msk.f32.mxu0 %vm1269_vm1, %v1270_v4 }
   0xd   :  { %1159 = vmatprep.subr.bf16.mxu0 %v1268_v0 }
  0x10   :  { %1161 = vmatpush3.bf16.msra.mxu0 %v1344_v8 }
  0x11   :  { %1168 = vmatprep.subr.bf16.mxu0 %v1268_v0 }
  0xde   :  { %v112_v12 = vpop.f32.mrb[0].mxu0 }
  0xdf   :  { %v116_v13 = vadd.f32 %v112_v12, %v41_v11  ;;  %v1055_v14 = vpop.f32.mrb[1].mxu0 }
  0xe1   :  { %1204 = vtanh.f32 %v116_v13  ;;  %v976_v17 = vmul.f32 -1.442695, %v116_v13 }
  0xe3   :  { %1206 = vpow2.f32 %v976_v17 }
  0xeb   :  { %v1205_v15 = vpop.eup %1204 }
  0xec   :  { %130 = vrot.lane.b32.xlu0 %v1205_v15, %s1271_s17 }
  0xed   :  { %v1207_v18 = vpop.eup %1206 }
  0xee   :  { %v120_v19 = vadd.f32 1.0, %v1207_v18 }
  0xf0   :  { %125 = vrot.lane.b32.xlu0 %v36_v16, %s1272_s18  ;;  %1208 = vrcp.f32 %v120_v19 }
  0xfa   :  { %v1209_v20 = vpop.eup %1208 }
 0x15e   :  { %v131_v21 = vpop.permute.xlu0 %130 }
 0x15f   :  { %v133_v22 = vmul.f32 %v1209_v20, %v131_v21 }
 0x161   :  { %135 = vrot.lane.b32.xlu1 %v133_v22, %s1272_s18 }
 0x162   :  { %v126_v23 = vpop.permute.xlu0 %125 }
 0x163   :  { %v128_v24 = vmul.f32 %v1209_v20, %v126_v23 }
 0x1d3   :  { %v136_v25 = vpop.permute.xlu1 %135 }
 0x1d4   :  { %v138_v26 = vadd.f32 %v136_v25, %v128_v24  ;;  %v986_v25 = vld [vmem:[%s1493_s0 + $0x20] sm:$0xff] }
 0x1d6   :  { %1210 = vtanh.f32 %v138_v26 }
 0x1e0   :  { %v1211_v27 = vpop.eup %1210 }
 0x1e1   :  { %141 = vrot.lane.b32.xlu1 %v1211_v27, %s1271_s17 }
 0x253   :  { %v142_v28 = vpop.permute.xlu1 %141 }
 0x254   :  { %v144_v29 = vmul.f32 %v1209_v20, %v142_v28 }
 0x256   :  { %148 = vrot.lane.b32.xlu0 %v144_v29, %s1272_s18 }
 0x2c8   :  { %v149_v30 = vpop.permute.xlu0 %148 }
 0x2c9   :  { %1065 = vmatmul.mubr.msk.f32.vlgmr.msra.gmra.mrb[0].mxu1 %vm31_vm0, %v149_v30 }
 0x2ca   :  { %1164 = vmatpush3.bf16.msra.mxu1 %v1331_v5  ;;  %1086 = vmatprep.mubr.msk.f32.mxu1 %vm1269_vm1, %v1270_v4 }
 0x2cb   :  { %1165 = vmatprep.subr.bf16.mxu1 %v1268_v0 }
 0x2ce   :  { %1167 = vmatpush3.bf16.msra.mxu1 %v1344_v8 }
 0x2cf   :  { %1174 = vmatprep.subr.bf16.mxu1 %v1268_v0 }
 0x39c   :  { %v218_v32 = vpop.f32.mrb[0].mxu1 }
 0x39d   :  { %v222_v33 = vadd.f32 %v977_v31, %v218_v32  ;;  %v1066_v34 = vpop.f32.mrb[1].mxu1 }
 0x39f   :  { %1212 = vtanh.f32 %v222_v33  ;;  %v979_v36 = vmul.f32 -1.442695, %v222_v33 }
 0x3a1   :  { %1214 = vpow2.f32 %v979_v36 }
 0x3a9   :  { %v1213_v35 = vpop.eup %1212 }
 0x3aa   :  { %232 = vrot.lane.b32.xlu1 %v1213_v35, %s1271_s17 }
 0x3ab   :  { %v1215_v37 = vpop.eup %1214 }
 0x3ac   :  { %v226_v38 = vadd.f32 1.0, %v1215_v37 }
 0x3ae   :  { %1216 = vrcp.f32 %v226_v38 }
 0x3b8   :  { %v1217_v39 = vpop.eup %1216 }
 0x3b9   :  { %v230_v42 = vmul.f32 %v1217_v39, %v138_v26 }
 0x41c   :  { %v233_v40 = vpop.permute.xlu1 %232 }
 0x41d   :  { %v235_v41 = vmul.f32 %v1217_v39, %v233_v40 }
 0x41f   :  { %237 = vrot.lane.b32.xlu0 %v235_v41, %s1272_s18 }
 0x491   :  { %v238_v43 = vpop.permute.xlu0 %237 }
 0x492   :  { %v240_v44 = vadd.f32 %v238_v43, %v230_v42  ;;  %v989_v43 = vld [vmem:[%s1493_s0 + $0x28] sm:$0xff] }
 0x494   :  { %1218 = vtanh.f32 %v240_v44 }
 0x49e   :  { %v1219_v45 = vpop.eup %1218 }
 0x49f   :  { %243 = vrot.lane.b32.xlu1 %v1219_v45, %s1271_s17 }
 0x511   :  { %v244_v46 = vpop.permute.xlu1 %243 }
 0x512   :  { %v246_v47 = vmul.f32 %v1217_v39, %v244_v46 }
 0x514   :  { %250 = vrot.lane.b32.xlu0 %v246_v47, %s1272_s18 }
 0x586   :  { %v251_v48 = vpop.permute.xlu0 %250 }
 0x587   :  { %1076 = vmatmul.mubr.msk.f32.vlgmr.msra.gmra.mrb[2].mxu0 %vm31_vm0, %v251_v48 }
 0x588   :  { %1170 = vmatpush3.bf16.msra.mxu0 %v1331_v5  ;;  %1097 = vmatprep.mubr.msk.f32.mxu0 %vm1269_vm1, %v1270_v4 }
 0x589   :  { %1171 = vmatprep.subr.bf16.mxu0 %v1268_v0 }
 0x58c   :  { %1173 = vmatpush3.bf16.msra.mxu0 %v1344_v8 }
 0x58d   :  { %1180 = vmatprep.subr.bf16.mxu0 %v1268_v0 }
 0x65a   :  { %v320_v50 = vpop.f32.mrb[2].mxu0 }
 0x65b   :  { %v324_v51 = vadd.f32 %v980_v49, %v320_v50  ;;  %v1077_v52 = vpop.f32.mrb[3].mxu0 }
 0x65d   :  { %1220 = vtanh.f32 %v324_v51  ;;  %v982_v54 = vmul.f32 -1.442695, %v324_v51 }
 0x65f   :  { %1222 = vpow2.f32 %v982_v54 }
 0x667   :  { %v1221_v53 = vpop.eup %1220 }
 0x668   :  { %334 = vrot.lane.b32.xlu1 %v1221_v53, %s1271_s17 }
 0x669   :  { %v1223_v55 = vpop.eup %1222 }
 0x66a   :  { %v328_v56 = vadd.f32 1.0, %v1223_v55 }
 0x66c   :  { %1224 = vrcp.f32 %v328_v56 }
 0x676   :  { %v1225_v57 = vpop.eup %1224 }
 0x677   :  { %v332_v60 = vmul.f32 %v1225_v57, %v240_v44 }
 0x6da   :  { %v335_v58 = vpop.permute.xlu1 %334 }
 0x6db   :  { %v337_v59 = vmul.f32 %v1225_v57, %v335_v58 }
 0x6dd   :  { %339 = vrot.lane.b32.xlu0 %v337_v59, %s1272_s18  ;;  %v992_v59 = vld [vmem:[%s1493_s0 + $0x30] sm:$0xff] }
 0x74f   :  { %v340_v61 = vpop.permute.xlu0 %339 }
 0x750   :  { %v342_v62 = vadd.f32 %v340_v61, %v332_v60 }
 0x752   :  { %1226 = vtanh.f32 %v342_v62 }
 0x75c   :  { %v1227_v63 = vpop.eup %1226 }
 0x75d   :  { %345 = vrot.lane.b32.xlu1 %v1227_v63, %s1271_s17 }
 0x7cf   :  { %v346_v1 = vpop.permute.xlu1 %345 }
 0x7d0   :  { %v348_v2 = vmul.f32 %v1225_v57, %v346_v1 }
 0x7d2   :  { %352 = vrot.lane.b32.xlu0 %v348_v2, %s1272_s18 }
 0x844   :  { %v353_v3 = vpop.permute.xlu0 %352 }
 0x845   :  { %1087 = vmatmul.mubr.msk.f32.vlgmr.msra.gmra.mrb[2].mxu1 %vm31_vm0, %v353_v3 }
 0x846   :  { %1176 = vmatpush3.bf16.msra.mxu1 %v1331_v5  ;;  %1108 = vmatprep.mubr.msk.f32.mxu1 %vm1269_vm1, %v1270_v4 }
 0x847   :  { %1177 = vmatprep.subr.bf16.mxu1 %v1268_v0 }
 0x84a   :  { %1179 = vmatpush3.bf16.msra.mxu1 %v1344_v8 }
 0x84b   :  { %1186 = vmatprep.subr.bf16.mxu1 %v1268_v0 }
 0x918   :  { %v422_v7 = vpop.f32.mrb[2].mxu1 }
 0x919   :  { %v426_v9 = vadd.f32 %v983_v6, %v422_v7  ;;  %v1088_v10 = vpop.f32.mrb[3].mxu1 }
 0x91b   :  { %1228 = vtanh.f32 %v426_v9  ;;  %v985_v12 = vmul.f32 -1.442695, %v426_v9 }
 0x91d   :  { %1230 = vpow2.f32 %v985_v12 }
 0x925   :  { %v1229_v11 = vpop.eup %1228 }
 0x926   :  { %436 = vrot.lane.b32.xlu1 %v1229_v11, %s1271_s17 }
 0x927   :  { %v1231_v13 = vpop.eup %1230 }
 0x928   :  { %v430_v14 = vadd.f32 1.0, %v1231_v13 }
 0x92a   :  { %1232 = vrcp.f32 %v430_v14 }
 0x934   :  { %v1233_v15 = vpop.eup %1232 }
 0x935   :  { %v434_v18 = vmul.f32 %v1233_v15, %v342_v62 }
 0x998   :  { %v437_v16 = vpop.permute.xlu1 %436 }
 0x999   :  { %v439_v17 = vmul.f32 %v1233_v15, %v437_v16  ;;  %v995_v16 = vld [vmem:[%s1493_s0 + $0x38] sm:$0xff] }
 0x99b   :  { %441 = vrot.lane.b32.xlu0 %v439_v17, %s1272_s18 }
 0xa0d   :  { %v442_v19 = vpop.permute.xlu0 %441 }
 0xa0e   :  { %v444_v20 = vadd.f32 %v442_v19, %v434_v18 }
 0xa10   :  { %1234 = vtanh.f32 %v444_v20 }
 0xa1a   :  { %v1235_v21 = vpop.eup %1234 }
 0xa1b   :  { %447 = vrot.lane.b32.xlu1 %v1235_v21, %s1271_s17 }
 0xa8d   :  { %v448_v22 = vpop.permute.xlu1 %447 }
 0xa8e   :  { %v450_v23 = vmul.f32 %v1233_v15, %v448_v22 }
 0xa90   :  { %454 = vrot.lane.b32.xlu0 %v450_v23, %s1272_s18 }
 0xb02   :  { %v455_v24 = vpop.permute.xlu0 %454 }
 0xb03   :  { %1098 = vmatmul.mubr.msk.f32.vlgmr.msra.gmra.mrb[4].mxu0 %vm31_vm0, %v455_v24 }
 0xb04   :  { %1182 = vmatpush3.bf16.msra.mxu0 %v1331_v5  ;;  %1119 = vmatprep.mubr.msk.f32.mxu0 %vm1269_vm1, %v1270_v4 }
 0xb05   :  { %1183 = vmatprep.subr.bf16.mxu0 %v1268_v0 }
 0xb08   :  { %1185 = vmatpush3.bf16.msra.mxu0 %v1344_v8 }
 0xb09   :  { %1192 = vmatprep.subr.bf16.mxu0 %v1268_v0 }
 0xbd6   :  { %v524_v26 = vpop.f32.mrb[4].mxu0 }
 0xbd7   :  { %v528_v27 = vadd.f32 %v986_v25, %v524_v26  ;;  %v1099_v28 = vpop.f32.mrb[5].mxu0 }
 0xbd9   :  { %1236 = vtanh.f32 %v528_v27  ;;  %v988_v30 = vmul.f32 -1.442695, %v528_v27 }
 0xbdb   :  { %1238 = vpow2.f32 %v988_v30  ;;  %v875_v30 = vld [vmem:[%s1494_s4] sm:$0xff] }
 0xbe3   :  { %v1237_v29 = vpop.eup %1236 }
 0xbe4   :  { %538 = vrot.lane.b32.xlu1 %v1237_v29, %s1271_s17 }
 0xbe5   :  { %v1239_v31 = vpop.eup %1238 }
 0xbe6   :  { %v532_v32 = vadd.f32 1.0, %v1239_v31  ;;  %v876_v31 = vld [vmem:[%s1494_s4 + $0x8] sm:$0xff] }
 0xbe8   :  { %1240 = vrcp.f32 %v532_v32  ;;  %v877_v32 = vld [vmem:[%s1494_s4 + $0x10] sm:$0xff] }
 0xbf2   :  { %v1241_v33 = vpop.eup %1240 }
 0xbf3   :  { %v536_v36 = vmul.f32 %v1241_v33, %v444_v20 }
 0xc56   :  { %v539_v34 = vpop.permute.xlu1 %538 }
 0xc57   :  { %v541_v35 = vmul.f32 %v1241_v33, %v539_v34  ;;  %v878_v34 = vld [vmem:[%s1494_s4 + $0x18] sm:$0xff] }
 0xc59   :  { %543 = vrot.lane.b32.xlu0 %v541_v35, %s1272_s18 }
 0xccb   :  { %v544_v37 = vpop.permute.xlu0 %543 }
 0xccc   :  { %v546_v38 = vadd.f32 %v544_v37, %v536_v36  ;;  %v1196_v36 = vpack.c.bf16 %v878_v34, %v877_v32 }
 0xcce   :  { %1242 = vtanh.f32 %v546_v38 }
 0xcd8   :  { %v1243_v39 = vpop.eup %1242 }
 0xcd9   :  { %549 = vrot.lane.b32.xlu1 %v1243_v39, %s1271_s17 }
 0xd4b   :  { %v550_v40 = vpop.permute.xlu1 %549 }
 0xd4c   :  { %v552_v41 = vmul.f32 %v1241_v33, %v550_v40  ;;  %v1193_v33 = vpack.c.bf16 %v876_v31, %v875_v30 }
 0xd4e   :  { %556 = vrot.lane.b32.xlu0 %v552_v41, %s1272_s18 }
 0xdc0   :  { %v557_v42 = vpop.permute.xlu0 %556 }
 0xdc1   :  { %1109 = vmatmul.mubr.msk.f32.vlgmr.msra.gmra.mrb[4].mxu1 %vm31_vm0, %v557_v42  ;;  %v998_v42 = vld [vmem:[%s1497_s5] ss:$0 sm:$0xff] }
 0xdc2   :  { %1188 = vmatpush3.bf16.msra.mxu1 %v1331_v5  ;;  %1130 = vmatprep.mubr.msk.f32.mxu1 %vm1269_vm1, %v1270_v4 }
 0xdc3   :  { %1189 = vmatprep.subr.bf16.mxu1 %v1268_v0 }
 0xdc6   :  { %1191 = vmatpush3.bf16.msra.mxu1 %v1344_v8 }
 0xe94   :  { %v626_v44 = vpop.f32.mrb[4].mxu1 }
 0xe95   :  { %v630_v45 = vadd.f32 %v989_v43, %v626_v44  ;;  %v1110_v46 = vpop.f32.mrb[5].mxu1 }
 0xe97   :  { %1244 = vtanh.f32 %v630_v45  ;;  %v991_v48 = vmul.f32 -1.442695, %v630_v45 }
 0xe99   :  { %1246 = vpow2.f32 %v991_v48 }
 0xea1   :  { %v1245_v47 = vpop.eup %1244 }
 0xea2   :  { %640 = vrot.lane.b32.xlu1 %v1245_v47, %s1271_s17 }
 0xea3   :  { %v1247_v5 = vpop.eup %1246 }
 0xea4   :  { %v634_v49 = vadd.f32 1.0, %v1247_v5 }
 0xea6   :  { %1248 = vrcp.f32 %v634_v49 }
 0xeb0   :  { %v1249_v50 = vpop.eup %1248 }
 0xeb1   :  { %v638_v8 = vmul.f32 %v1249_v50, %v546_v38 }
 0xf14   :  { %v641_v51 = vpop.permute.xlu1 %640 }
 0xf15   :  { %v643_v52 = vmul.f32 %v1249_v50, %v641_v51 }
 0xf17   :  { %645 = vrot.lane.b32.xlu0 %v643_v52, %s1272_s18 }
 0xf89   :  { %v646_v53 = vpop.permute.xlu0 %645 }
 0xf8a   :  { %v648_v54 = vadd.f32 %v646_v53, %v638_v8 }
 0xf8c   :  { %1250 = vtanh.f32 %v648_v54 }
 0xf96   :  { %v1251_v55 = vpop.eup %1250 }
 0xf97   :  { %651 = vrot.lane.b32.xlu1 %v1251_v55, %s1271_s17 }
0x1009   :  { %v652_v56 = vpop.permute.xlu1 %651 }
0x100a   :  { %v654_v57 = vmul.f32 %v1249_v50, %v652_v56 }
0x100c   :  { %658 = vrot.lane.b32.xlu0 %v654_v57, %s1272_s18 }
0x107e   :  { %v659_v58 = vpop.permute.xlu0 %658 }
0x107f   :  { %1120 = vmatmul.mubr.msk.f32.vlgmr.msra.gmra.mrb[6].mxu0 %vm31_vm0, %v659_v58 }
0x1080   :  { %1141 = vmatprep.mubr.msk.f32.mxu0 %vm1269_vm1, %v1270_v4  ;;  %1194 = vmatpush3.bf16.msra.mxu0 %v1193_v33 }
0x1081   :  { %1195 = vmatprep.subr.bf16.mxu0 %v1268_v0 }
0x1084   :  { %1197 = vmatpush3.bf16.msra.mxu0 %v1196_v36 }
0x1152   :  { %v728_v60 = vpop.f32.mrb[6].mxu0 }
0x1153   :  { %v732_v61 = vadd.f32 %v992_v59, %v728_v60  ;;  %v1121_v62 = vpop.f32.mrb[7].mxu0 }
0x1155   :  { %1252 = vtanh.f32 %v732_v61  ;;  %v994_v1 = vmul.f32 -1.442695, %v732_v61 }
0x1157   :  { %1254 = vpow2.f32 %v994_v1 }
0x115f   :  { %v1253_v63 = vpop.eup %1252 }
0x1160   :  { %742 = vrot.lane.b32.xlu1 %v1253_v63, %s1271_s17 }
0x1161   :  { %v1255_v2 = vpop.eup %1254 }
0x1162   :  { %v736_v3 = vadd.f32 1.0, %v1255_v2 }
0x1164   :  { %1256 = vrcp.f32 %v736_v3 }
0x116e   :  { %v1257_v6 = vpop.eup %1256 }
0x116f   :  { %v740_v4 = vmul.f32 %v1257_v6, %v648_v54 }
0x11d2   :  { %v743_v7 = vpop.permute.xlu1 %742 }
0x11d3   :  { %v745_v9 = vmul.f32 %v1257_v6, %v743_v7 }
0x11d5   :  { %747 = vrot.lane.b32.xlu0 %v745_v9, %s1272_s18 }
0x1247   :  { %v748_v10 = vpop.permute.xlu0 %747 }
0x1248   :  { %v750_v11 = vadd.f32 %v748_v10, %v740_v4 }
0x124a   :  { %1258 = vtanh.f32 %v750_v11 }
0x1254   :  { %v1259_v12 = vpop.eup %1258 }
0x1255   :  { %753 = vrot.lane.b32.xlu1 %v1259_v12, %s1271_s17 }
0x12c7   :  { %v754_v13 = vpop.permute.xlu1 %753 }
0x12c8   :  { %v756_v14 = vmul.f32 %v1257_v6, %v754_v13 }
0x12ca   :  { %760 = vrot.lane.b32.xlu0 %v756_v14, %s1272_s18 }
0x133c   :  { %v761_v15 = vpop.permute.xlu0 %760 }
0x133d   :  { %1131 = vmatmul.mubr.msk.f32.vlgmr.msra.gmra.mrb[6].mxu1 %vm31_vm0, %v761_v15 }
0x1410   :  { %v830_v17 = vpop.f32.mrb[6].mxu1 }
0x1411   :  { %v834_v18 = vadd.f32 %v995_v16, %v830_v17  ;;  %v1132_v19 = vpop.f32.mrb[7].mxu1 }
0x1413   :  { %1260 = vtanh.f32 %v834_v18  ;;  %v997_v21 = vmul.f32 -1.442695, %v834_v18 }
0x1415   :  { %1262 = vpow2.f32 %v997_v21 }
0x141d   :  { %v1261_v20 = vpop.eup %1260 }
0x141e   :  { %844 = vrot.lane.b32.xlu1 %v1261_v20, %s1271_s17 }
0x141f   :  { %v1263_v22 = vpop.eup %1262 }
0x1420   :  { %v838_v23 = vadd.f32 1.0, %v1263_v22 }
0x1422   :  { %1264 = vrcp.f32 %v838_v23 }
0x142c   :  { %v1265_v24 = vpop.eup %1264 }
0x142d   :  { %v842_v27 = vmul.f32 %v1265_v24, %v750_v11 }
0x1490   :  { %v845_v25 = vpop.permute.xlu1 %844 }
0x1491   :  { %v847_v26 = vmul.f32 %v1265_v24, %v845_v25 }
0x1493   :  { %849 = vrot.lane.b32.xlu0 %v847_v26, %s1272_s18 }
0x1505   :  { %v850_v28 = vpop.permute.xlu0 %849 }
0x1506   :  { %v852_v29 = vadd.f32 %v850_v28, %v842_v27 }
0x1508   :  { %1266 = vtanh.f32 %v852_v29 }
0x1512   :  { %v1267_v35 = vpop.eup %1266 }
0x1513   :  { %855 = vrot.lane.b32.xlu1 %v1267_v35, %s1271_s17 }
0x1585   :  { %v856_v37 = vpop.permute.xlu1 %855 }
0x1586   :  { %v858_v38 = vmul.f32 %v1265_v24, %v856_v37 }
0x1588   :  { %v874_v39 = vmax.f32 %v858_v38, 0.0  ;;  %860 = vrot.lane.b32.xlu1 %v858_v38, %s1272_s18 }
0x158a   :  { %887 = vrot.lane.b32.xlu0 %v874_v39, %s1272_s18 }
0x158e   :  { %865 = vrot.lane.b32.xlu0 %v852_v29, %s1273_s15 }
0x15fa   :  { %v861_v40 = vpop.permute.xlu1 %860 }
0x15fb   :  { %863 = vst.msk [vmem:[#allocation2] sm:$0xff] %vm31_vm0, %v861_v40  ;;  %869 = vst.msk [vmem:[%s1495_s7] sm:$0xff] %vm31_vm0, %v861_v40 }
0x15fc   :  { %v888_v41 = vpop.permute.xlu0 %887 }
0x15fd   :  { %1142 = vmatmul.mubr.msk.f32.vlgmr.msra.gmra.mrb[8].mxu0 %vm31_vm0, %v888_v41 }
0x1600   :  { %v866_v0 = vpop.permute.xlu0 %865 }
0x1601   :  { %868 = vst.msk [vmem:[#allocation3] sm:$0xff] %vm31_vm0, %v866_v0  ;;  %870 = vst.msk [vmem:[%s1496_s8] sm:$0xff] %vm31_vm0, %v866_v0 }
0x16d0   :  { %v957_v43 = vpop.f32.mrb[8].mxu0 }
0x16d1   :  { %v958_v44 = vadd.f32 %v998_v42, %v957_v43  ;;  %v1143_v45 = vpop.f32.mrb[9].mxu0 }
0x16d3   :  { %962 = vst.msk [vmem:[%s1498_s6] sm:$0xff] %vm961_vm2, %v958_v44 }

</bundles_post_ra>
